<compile_context>
chip_gen: v5e
topology: v5e:2x2
jax: 0.10.0
libtpu: 0.0.40
codegen_flags: <defaults>
</compile_context>

<pallas_src>
import functools
import math

import jax
import jax.numpy as jnp
from jax.experimental import pallas as pl
from jax.experimental.pallas import tpu as pltpu


def _round_up(x, m):
    return ((x + m - 1) // m) * m


def _pick_dim(dim, granule, max_tile):
    """Return (padded_dim, tile): full dim when it fits, else granule-aligned tiles."""
    if dim <= max_tile:
        return dim, dim
    tile = max(granule, (max_tile // granule) * granule)
    return _round_up(dim, tile), tile


def _conv_kernel(w_ref, x_ref, b_ref, o_ref, acc_ref, *,
                 kh, kw, stride, oh, ow, pitch):
    """One (n, oc_tile) output tile; grid axis 2 reduces over input-channel tiles.

    w_ref:   (KH*KW, t_oc, t_c)  weights; w_ref[i*KW + j] is the 2-D tap matrix.
    x_ref:   (1, t_c, L)         padded image, spatial dims flattened at row
                                 pitch `pitch` (= padded width) + tail slack.
    b_ref:   (t_oc, 1)           bias (float32).
    o_ref:   (1, t_oc, OH, OW)   output tile (NCHW).
    acc_ref: (t_oc, OH*pitch)    float32 accumulator at the *padded* row pitch.
    """
    c_step = pl.program_id(2)
    m_pad = oh * pitch

    @pl.when(c_step == 0)
    def _init():
        acc_ref[...] = jnp.zeros_like(acc_ref)

    # Implicit GEMM: for kernel tap (i, j) the needed window is one (strided)
    # slice of the flattened padded image, because
    #   x_pad[c, i + oh*s, j + ow*s] == x_flat[c, i*pitch + j + s*(oh*pitch + ow)]
    # so each tap is a single (t_oc, t_c) x (t_c, OH*pitch) matmul accumulated
    # at padded pitch; the unused tail columns of each row are ignored below.
    for i in range(kh):
        for j in range(kw):
            start = i * pitch + j
            if stride == 1:
                xs = x_ref[0, :, start:start + m_pad]
            else:
                # TODO(synk): verify strided lane-slice lowering for stride > 1
                # on all generations (unused by the stride=1 test below).
                xs = x_ref[0, :, pl.ds(start, m_pad, stride=stride)]
            acc_ref[...] += jnp.dot(
                w_ref[i * kw + j], xs, preferred_element_type=jnp.float32)

    @pl.when(c_step == pl.num_programs(2) - 1)
    def _finalize():
        bias = b_ref[...]                                   # (t_oc, 1)
        for r in range(oh):                                 # pitch -> OW rows
            row = acc_ref[:, r * pitch:r * pitch + ow] + bias
            row = jnp.minimum(jnp.maximum(row, 0.0), 6.0)   # ReLU6
            o_ref[0, :, r, :] = row.astype(o_ref.dtype)


@functools.partial(jax.jit,
                   static_argnames=("stride", "padding", "compute_dtype"))
def basic_conv2d(x, weight, bias, *, stride=1, padding=0,
                 compute_dtype=jnp.float32):
    """Forward of BasicConv2d: y = ReLU6(Conv2d(x; weight, bias)).

    x:      (N, C, H, W)     float32
    weight: (OC, C, KH, KW)  float32
    bias:   (OC,)            float32
    compute_dtype: MXU operand dtype.  float32 (default) matches PyTorch
        numerics; bfloat16 halves activation/weight HBM bytes (accumulation is
        float32 either way).
    returns (N, OC, OH, OW)  x.dtype, NCHW (written directly by the kernel).
    """
    n, c, h, w = x.shape
    oc, c_w, kh, kw = weight.shape
    assert c == c_w, "channel mismatch"
    s, p = int(stride), int(padding)
    oh = (h + 2 * p - kh) // s + 1
    ow = (w + 2 * p - kw) // s + 1
    hp, wp = h + 2 * p, w + 2 * p
    pitch = wp
    m_pad = oh * pitch
    dsize = jnp.dtype(compute_dtype).itemsize

    # Tail slack so every shifted window stays in bounds (appended as extra
    # zero rows; becomes part of the never-read garbage columns).
    extra = (s - 1) * pitch + (kw - 1)
    extra_rows = -(-extra // pitch) if extra else 0
    flat_len = (hp + extra_rows) * pitch

    # --- tile selection: full dims when they fit a conservative VMEM budget ---
    budget = 8 << 20                       # per-operand target (x2 for dbl-buffer)
    oc_granule = 16 if dsize == 2 else 8   # bf16 packs two rows per sublane
    c_granule = 128                        # lane dim of the weight block when tiled
    max_tc = max(c_granule, budget // max(1, flat_len * dsize))
    max_toc = min(256, max(oc_granule, budget // max(1, m_pad * 4)))
    c_pad, t_c = _pick_dim(c, c_granule, max_tc)
    oc_pad, t_oc = _pick_dim(oc, oc_granule, max_toc)
    # TODO(synk): add halo'd OH tiling for very large feature maps where a full
    # (t_c, HP*WP) image slab / (t_oc, OH*WP) accumulator does not fit VMEM.

    # --- operand prep (pad-only HBM traffic; no im2col patch matrix) ---
    xf = x
    if p or extra_rows:
        xf = jnp.pad(xf, ((0, 0), (0, 0), (p, p + extra_rows), (p, p)))
    if c_pad != c:
        xf = jnp.pad(xf, ((0, 0), (0, c_pad - c), (0, 0), (0, 0)))
    xf = xf.reshape(n, c_pad, flat_len).astype(compute_dtype)

    w3 = weight
    if c_pad != c or oc_pad != oc:
        w3 = jnp.pad(w3, ((0, oc_pad - oc), (0, c_pad - c), (0, 0), (0, 0)))
    w3 = w3.transpose(2, 3, 0, 1).reshape(kh * kw, oc_pad, c_pad)
    w3 = w3.astype(compute_dtype)

    b2 = bias if oc_pad == oc else jnp.pad(bias, (0, oc_pad - oc))
    b2 = b2.reshape(oc_pad, 1).astype(jnp.float32)

    grid = (n, oc_pad // t_oc, c_pad // t_c)

    # Explicit VMEM limit derived from the footprint (safe on v5e/v6e/v7x).
    footprint = (2 * (t_c * flat_len * dsize
                      + kh * kw * t_oc * t_c * dsize
                      + t_oc * 4
                      + t_oc * oh * ow * x.dtype.itemsize)
                 + t_oc * m_pad * 4)
    vmem_limit = int(min(64 << 20, max(32 << 20, 2 * footprint)))

    kernel = functools.partial(_conv_kernel, kh=kh, kw=kw, stride=s,
                               oh=oh, ow=ow, pitch=pitch)

    out = pl.pallas_call(
        kernel,
        out_shape=jax.ShapeDtypeStruct((n, oc_pad, oh, ow), x.dtype),
        grid=grid,
        in_specs=[
            pl.BlockSpec((kh * kw, t_oc, t_c), lambda ni, i, ci: (0, i, ci)),
            pl.BlockSpec((1, t_c, flat_len), lambda ni, i, ci: (ni, ci, 0)),
            pl.BlockSpec((t_oc, 1), lambda ni, i, ci: (i, 0)),
        ],
        out_specs=pl.BlockSpec((1, t_oc, oh, ow),
                               lambda ni, i, ci: (ni, i, 0, 0)),
        scratch_shapes=[pltpu.VMEM((t_oc, m_pad), jnp.float32)],
        compiler_params=pltpu.CompilerParams(
            dimension_semantics=("parallel", "parallel", "arbitrary"),
            vmem_limit_bytes=vmem_limit,
        ),
    )(w3, xf, b2)

    if oc_pad != oc:
        out = out[:, :oc]
    return out


if __name__ == "__main__":
    key = jax.random.PRNGKey(0)
    kx, kw_, kb = jax.random.split(key, 3)

    # BasicConv2d(in_channels=4, out_channels=8, kernel_size=3, padding=1)
    N, C, H, W = 2, 4, 16, 16
    OC, KH, KW = 8, 3, 3
    STRIDE, PAD = 1, 1

    x = jax.random.normal(kx, (N, C, H, W), dtype=jnp.float32)
    fan_in = C * KH * KW
    bound = 1.0 / math.sqrt(fan_in)
    weight = jax.random.uniform(kw_, (OC, C, KH, KW), jnp.float32, -bound, bound)
    bias = jax.random.uniform(kb, (OC,), jnp.float32, -bound, bound)

    # float32 path (default; PyTorch-matching semantics).
    out = basic_conv2d(x, weight, bias, stride=STRIDE, padding=PAD)
    out = jax.block_until_ready(out)

    ref_f32 = jax.lax.conv_general_dilated(
        x, weight, window_strides=(STRIDE, STRIDE),
        padding=[(PAD, PAD), (PAD, PAD)],
        dimension_numbers=("NCHW", "OIHW", "NCHW"),
        precision=jax.lax.Precision.HIGHEST,
    ) + bias.reshape(1, OC, 1, 1)
    ref_f32 = jnp.clip(ref_f32, 0.0, 6.0)

    assert out.shape == (N, OC, H, W)
    # Tolerance covers a possible default-precision (bf16-pass) f32 matmul on
    # the MXU vs the HIGHEST-precision XLA reference.
    assert jnp.allclose(out, ref_f32, atol=1e-2, rtol=1e-2), (
        float(jnp.max(jnp.abs(out - ref_f32))))

    # bfloat16 compute path (halved HBM traffic, f32 accumulation).
    out_bf16 = basic_conv2d(x, weight, bias, stride=STRIDE, padding=PAD,
                            compute_dtype=jnp.bfloat16)
    out_bf16 = jax.block_until_ready(out_bf16)
    ref_bf16 = jax.lax.conv_general_dilated(
        x.astype(jnp.bfloat16), weight.astype(jnp.bfloat16),
        window_strides=(STRIDE, STRIDE),
        padding=[(PAD, PAD), (PAD, PAD)],
        dimension_numbers=("NCHW", "OIHW", "NCHW"),
        preferred_element_type=jnp.float32,
    ) + bias.reshape(1, OC, 1, 1)
    ref_bf16 = jnp.clip(ref_bf16, 0.0, 6.0).astype(jnp.float32)
    assert jnp.allclose(out_bf16, ref_bf16, atol=5e-3, rtol=5e-3), (
        float(jnp.max(jnp.abs(out_bf16 - ref_bf16))))

    print("KERNEL_OK")
</pallas_src>

<mosaic_0001>
module attributes {stable_mosaic.version = 11 : i64} {
  func.func @_conv_kernel(%arg0: i32, %arg1: i32, %arg2: i32, %arg3: memref<9x8x4xf32, #tpu.memory_space<vmem>>, %arg4: memref<1x4x342xf32, #tpu.memory_space<vmem>>, %arg5: memref<8x1xf32, #tpu.memory_space<vmem>>, %arg6: memref<1x8x16x16xf32, #tpu.memory_space<vmem>>, %arg7: memref<8x288xf32, #tpu.memory_space<vmem>>) attributes {dimension_semantics = [#tpu.dimension_semantics<parallel>, #tpu.dimension_semantics<parallel>, #tpu.dimension_semantics<arbitrary>], iteration_bounds = array<i64: 2, 1, 1>, scalar_prefetch = 0 : i64, scratch_operands = 1 : i64, tpu.core_type = #tpu.core_type<tc>, window_params = [{transform_indices = @transform_0, window_bounds = array<i64: 9, 8, 4>}, {transform_indices = @transform_1, window_bounds = array<i64: 1, 4, 342>}, {transform_indices = @transform_2, window_bounds = array<i64: 8, 1>}, {transform_indices = @transform_3, window_bounds = array<i64: 1, 8, 16, 16>}]} {
    %c0_i32 = arith.constant 0 : i32
    %0 = arith.cmpi eq, %arg2, %c0_i32 : i32
    %1 = arith.extui %0 : i1 to i32
    %c0_i32_0 = arith.constant 0 : i32
    %2 = arith.cmpi ne, %1, %c0_i32_0 : i32
    scf.if %2 {
      %cst_86 = arith.constant 0.000000e+00 : f32
      %78 = vector.broadcast %cst_86 : f32 to vector<8x288xf32>
      %c0_87 = arith.constant 0 : index
      %c0_88 = arith.constant 0 : index
      %79 = vector.load %arg7[%c0_87, %c0_88] : memref<8x288xf32, #tpu.memory_space<vmem>>, vector<8x288xf32>
      tpu.vector_store %arg7[%c0_87, %c0_88], %78 {strides = array<i32>} : memref<8x288xf32, #tpu.memory_space<vmem>>, vector<8x288xf32>,
    } else {
    }
    %c0 = arith.constant 0 : index
    %c0_1 = arith.constant 0 : index
    %c0_2 = arith.constant 0 : index
    %3 = vector.load %arg4[%c0, %c0_1, %c0_2] : memref<1x4x342xf32, #tpu.memory_space<vmem>>, vector<1x4x288xf32>
    %4 = vector.shape_cast %3 : vector<1x4x288xf32> to vector<4x288xf32>
    %c0_3 = arith.constant 0 : index
    %c0_4 = arith.constant 0 : index
    %5 = vector.load %arg7[%c0_3, %c0_4] : memref<8x288xf32, #tpu.memory_space<vmem>>, vector<8x288xf32>
    %c0_5 = arith.constant 0 : index
    %c0_6 = arith.constant 0 : index
    %c0_7 = arith.constant 0 : index
    %6 = vector.load %arg3[%c0_5, %c0_6, %c0_7] : memref<9x8x4xf32, #tpu.memory_space<vmem>>, vector<1x8x4xf32>
    %7 = vector.shape_cast %6 : vector<1x8x4xf32> to vector<8x4xf32>
    %cst = arith.constant dense<0.000000e+00> : vector<8x288xf32>
    %8 = tpu.matmul %7, %4, %cst {dimension_numbers = #tpu.dot_dimension_numbers<[1], [0], [0], [1], [0, 0, 1, 1], [], []>} : vector<8x4xf32>, vector<4x288xf32>, vector<8x288xf32> -> vector<8x288xf32>
    %9 = arith.addf %5, %8 : vector<8x288xf32>
    %c0_8 = arith.constant 0 : index
    %c0_9 = arith.constant 0 : index
    %10 = vector.load %arg7[%c0_8, %c0_9] : memref<8x288xf32, #tpu.memory_space<vmem>>, vector<8x288xf32>
    tpu.vector_store %arg7[%c0_8, %c0_9], %9 {strides = array<i32>} : memref<8x288xf32, #tpu.memory_space<vmem>>, vector<8x288xf32>,
    %c0_10 = arith.constant 0 : index
    %c0_11 = arith.constant 0 : index
    %c1 = arith.constant 1 : index
    %11 = vector.load %arg4[%c0_10, %c0_11, %c1] : memref<1x4x342xf32, #tpu.memory_space<vmem>>, vector<1x4x288xf32>
    %12 = vector.shape_cast %11 : vector<1x4x288xf32> to vector<4x288xf32>
    %c0_12 = arith.constant 0 : index
    %c0_13 = arith.constant 0 : index
    %13 = vector.load %arg7[%c0_12, %c0_13] : memref<8x288xf32, #tpu.memory_space<vmem>>, vector<8x288xf32>
    %c1_14 = arith.constant 1 : index
    %c0_15 = arith.constant 0 : index
    %c0_16 = arith.constant 0 : index
    %14 = vector.load %arg3[%c1_14, %c0_15, %c0_16] : memref<9x8x4xf32, #tpu.memory_space<vmem>>, vector<1x8x4xf32>
    %15 = vector.shape_cast %14 : vector<1x8x4xf32> to vector<8x4xf32>
    %cst_17 = arith.constant dense<0.000000e+00> : vector<8x288xf32>
    %16 = tpu.matmul %15, %12, %cst_17 {dimension_numbers = #tpu.dot_dimension_numbers<[1], [0], [0], [1], [0, 0, 1, 1], [], []>} : vector<8x4xf32>, vector<4x288xf32>, vector<8x288xf32> -> vector<8x288xf32>
    %17 = arith.addf %13, %16 : vector<8x288xf32>
    %c0_18 = arith.constant 0 : index
    %c0_19 = arith.constant 0 : index
    %18 = vector.load %arg7[%c0_18, %c0_19] : memref<8x288xf32, #tpu.memory_space<vmem>>, vector<8x288xf32>
    tpu.vector_store %arg7[%c0_18, %c0_19], %17 {strides = array<i32>} : memref<8x288xf32, #tpu.memory_space<vmem>>, vector<8x288xf32>,
    %c0_20 = arith.constant 0 : index
    %c0_21 = arith.constant 0 : index
    %c2 = arith.constant 2 : index
    %19 = vector.load %arg4[%c0_20, %c0_21, %c2] : memref<1x4x342xf32, #tpu.memory_space<vmem>>, vector<1x4x288xf32>
    %20 = vector.shape_cast %19 : vector<1x4x288xf32> to vector<4x288xf32>
    %c0_22 = arith.constant 0 : index
    %c0_23 = arith.constant 0 : index
    %21 = vector.load %arg7[%c0_22, %c0_23] : memref<8x288xf32, #tpu.memory_space<vmem>>, vector<8x288xf32>
    %c2_24 = arith.constant 2 : index
    %c0_25 = arith.constant 0 : index
    %c0_26 = arith.constant 0 : index
    %22 = vector.load %arg3[%c2_24, %c0_25, %c0_26] : memref<9x8x4xf32, #tpu.memory_space<vmem>>, vector<1x8x4xf32>
    %23 = vector.shape_cast %22 : vector<1x8x4xf32> to vector<8x4xf32>
    %cst_27 = arith.constant dense<0.000000e+00> : vector<8x288xf32>
    %24 = tpu.matmul %23, %20, %cst_27 {dimension_numbers = #tpu.dot_dimension_numbers<[1], [0], [0], [1], [0, 0, 1, 1], [], []>} : vector<8x4xf32>, vector<4x288xf32>, vector<8x288xf32> -> vector<8x288xf32>
    %25 = arith.addf %21, %24 : vector<8x288xf32>
    %c0_28 = arith.constant 0 : index
    %c0_29 = arith.constant 0 : index
    %26 = vector.load %arg7[%c0_28, %c0_29] : memref<8x288xf32, #tpu.memory_space<vmem>>, vector<8x288xf32>
    tpu.vector_store %arg7[%c0_28, %c0_29], %25 {strides = array<i32>} : memref<8x288xf32, #tpu.memory_space<vmem>>, vector<8x288xf32>,
    %c0_30 = arith.constant 0 : index
    %c0_31 = arith.constant 0 : index
    %c18 = arith.constant 18 : index
    %27 = vector.load %arg4[%c0_30, %c0_31, %c18] : memref<1x4x342xf32, #tpu.memory_space<vmem>>, vector<1x4x288xf32>
    %28 = vector.shape_cast %27 : vector<1x4x288xf32> to vector<4x288xf32>
    %c0_32 = arith.constant 0 : index
    %c0_33 = arith.constant 0 : index
    %29 = vector.load %arg7[%c0_32, %c0_33] : memref<8x288xf32, #tpu.memory_space<vmem>>, vector<8x288xf32>
    %c3 = arith.constant 3 : index
    %c0_34 = arith.constant 0 : index
    %c0_35 = arith.constant 0 : index
    %30 = vector.load %arg3[%c3, %c0_34, %c0_35] : memref<9x8x4xf32, #tpu.memory_space<vmem>>, vector<1x8x4xf32>
    %31 = vector.shape_cast %30 : vector<1x8x4xf32> to vector<8x4xf32>
    %cst_36 = arith.constant dense<0.000000e+00> : vector<8x288xf32>
    %32 = tpu.matmul %31, %28, %cst_36 {dimension_numbers = #tpu.dot_dimension_numbers<[1], [0], [0], [1], [0, 0, 1, 1], [], []>} : vector<8x4xf32>, vector<4x288xf32>, vector<8x288xf32> -> vector<8x288xf32>
    %33 = arith.addf %29, %32 : vector<8x288xf32>
    %c0_37 = arith.constant 0 : index
    %c0_38 = arith.constant 0 : index
    %34 = vector.load %arg7[%c0_37, %c0_38] : memref<8x288xf32, #tpu.memory_space<vmem>>, vector<8x288xf32>
    tpu.vector_store %arg7[%c0_37, %c0_38], %33 {strides = array<i32>} : memref<8x288xf32, #tpu.memory_space<vmem>>, vector<8x288xf32>,
    %c0_39 = arith.constant 0 : index
    %c0_40 = arith.constant 0 : index
    %c19 = arith.constant 19 : index
    %35 = vector.load %arg4[%c0_39, %c0_40, %c19] : memref<1x4x342xf32, #tpu.memory_space<vmem>>, vector<1x4x288xf32>
    %36 = vector.shape_cast %35 : vector<1x4x288xf32> to vector<4x288xf32>
    %c0_41 = arith.constant 0 : index
    %c0_42 = arith.constant 0 : index
    %37 = vector.load %arg7[%c0_41, %c0_42] : memref<8x288xf32, #tpu.memory_space<vmem>>, vector<8x288xf32>
    %c4 = arith.constant 4 : index
    %c0_43 = arith.constant 0 : index
    %c0_44 = arith.constant 0 : index
    %38 = vector.load %arg3[%c4, %c0_43, %c0_44] : memref<9x8x4xf32, #tpu.memory_space<vmem>>, vector<1x8x4xf32>
    %39 = vector.shape_cast %38 : vector<1x8x4xf32> to vector<8x4xf32>
    %cst_45 = arith.constant dense<0.000000e+00> : vector<8x288xf32>
    %40 = tpu.matmul %39, %36, %cst_45 {dimension_numbers = #tpu.dot_dimension_numbers<[1], [0], [0], [1], [0, 0, 1, 1], [], []>} : vector<8x4xf32>, vector<4x288xf32>, vector<8x288xf32> -> vector<8x288xf32>
    %41 = arith.addf %37, %40 : vector<8x288xf32>
    %c0_46 = arith.constant 0 : index
    %c0_47 = arith.constant 0 : index
    %42 = vector.load %arg7[%c0_46, %c0_47] : memref<8x288xf32, #tpu.memory_space<vmem>>, vector<8x288xf32>
    tpu.vector_store %arg7[%c0_46, %c0_47], %41 {strides = array<i32>} : memref<8x288xf32, #tpu.memory_space<vmem>>, vector<8x288xf32>,
    %c0_48 = arith.constant 0 : index
    %c0_49 = arith.constant 0 : index
    %c20 = arith.constant 20 : index
    %43 = vector.load %arg4[%c0_48, %c0_49, %c20] : memref<1x4x342xf32, #tpu.memory_space<vmem>>, vector<1x4x288xf32>
    %44 = vector.shape_cast %43 : vector<1x4x288xf32> to vector<4x288xf32>
    %c0_50 = arith.constant 0 : index
    %c0_51 = arith.constant 0 : index
    %45 = vector.load %arg7[%c0_50, %c0_51] : memref<8x288xf32, #tpu.memory_space<vmem>>, vector<8x288xf32>
    %c5 = arith.constant 5 : index
    %c0_52 = arith.constant 0 : index
    %c0_53 = arith.constant 0 : index
    %46 = vector.load %arg3[%c5, %c0_52, %c0_53] : memref<9x8x4xf32, #tpu.memory_space<vmem>>, vector<1x8x4xf32>
    %47 = vector.shape_cast %46 : vector<1x8x4xf32> to vector<8x4xf32>
    %cst_54 = arith.constant dense<0.000000e+00> : vector<8x288xf32>
    %48 = tpu.matmul %47, %44, %cst_54 {dimension_numbers = #tpu.dot_dimension_numbers<[1], [0], [0], [1], [0, 0, 1, 1], [], []>} : vector<8x4xf32>, vector<4x288xf32>, vector<8x288xf32> -> vector<8x288xf32>
    %49 = arith.addf %45, %48 : vector<8x288xf32>
    %c0_55 = arith.constant 0 : index
    %c0_56 = arith.constant 0 : index
    %50 = vector.load %arg7[%c0_55, %c0_56] : memref<8x288xf32, #tpu.memory_space<vmem>>, vector<8x288xf32>
    tpu.vector_store %arg7[%c0_55, %c0_56], %49 {strides = array<i32>} : memref<8x288xf32, #tpu.memory_space<vmem>>, vector<8x288xf32>,
    %c0_57 = arith.constant 0 : index
    %c0_58 = arith.constant 0 : index
    %c36 = arith.constant 36 : index
    %51 = vector.load %arg4[%c0_57, %c0_58, %c36] : memref<1x4x342xf32, #tpu.memory_space<vmem>>, vector<1x4x288xf32>
    %52 = vector.shape_cast %51 : vector<1x4x288xf32> to vector<4x288xf32>
    %c0_59 = arith.constant 0 : index
    %c0_60 = arith.constant 0 : index
    %53 = vector.load %arg7[%c0_59, %c0_60] : memref<8x288xf32, #tpu.memory_space<vmem>>, vector<8x288xf32>
    %c6 = arith.constant 6 : index
    %c0_61 = arith.constant 0 : index
    %c0_62 = arith.constant 0 : index
    %54 = vector.load %arg3[%c6, %c0_61, %c0_62] : memref<9x8x4xf32, #tpu.memory_space<vmem>>, vector<1x8x4xf32>
    %55 = vector.shape_cast %54 : vector<1x8x4xf32> to vector<8x4xf32>
    %cst_63 = arith.constant dense<0.000000e+00> : vector<8x288xf32>
    %56 = tpu.matmul %55, %52, %cst_63 {dimension_numbers = #tpu.dot_dimension_numbers<[1], [0], [0], [1], [0, 0, 1, 1], [], []>} : vector<8x4xf32>, vector<4x288xf32>, vector<8x288xf32> -> vector<8x288xf32>
    %57 = arith.addf %53, %56 : vector<8x288xf32>
    %c0_64 = arith.constant 0 : index
    %c0_65 = arith.constant 0 : index
    %58 = vector.load %arg7[%c0_64, %c0_65] : memref<8x288xf32, #tpu.memory_space<vmem>>, vector<8x288xf32>
    tpu.vector_store %arg7[%c0_64, %c0_65], %57 {strides = array<i32>} : memref<8x288xf32, #tpu.memory_space<vmem>>, vector<8x288xf32>,
    %c0_66 = arith.constant 0 : index
    %c0_67 = arith.constant 0 : index
    %c37 = arith.constant 37 : index
    %59 = vector.load %arg4[%c0_66, %c0_67, %c37] : memref<1x4x342xf32, #tpu.memory_space<vmem>>, vector<1x4x288xf32>
    %60 = vector.shape_cast %59 : vector<1x4x288xf32> to vector<4x288xf32>
    %c0_68 = arith.constant 0 : index
    %c0_69 = arith.constant 0 : index
    %61 = vector.load %arg7[%c0_68, %c0_69] : memref<8x288xf32, #tpu.memory_space<vmem>>, vector<8x288xf32>
    %c7 = arith.constant 7 : index
    %c0_70 = arith.constant 0 : index
    %c0_71 = arith.constant 0 : index
    %62 = vector.load %arg3[%c7, %c0_70, %c0_71] : memref<9x8x4xf32, #tpu.memory_space<vmem>>, vector<1x8x4xf32>
    %63 = vector.shape_cast %62 : vector<1x8x4xf32> to vector<8x4xf32>
    %cst_72 = arith.constant dense<0.000000e+00> : vector<8x288xf32>
    %64 = tpu.matmul %63, %60, %cst_72 {dimension_numbers = #tpu.dot_dimension_numbers<[1], [0], [0], [1], [0, 0, 1, 1], [], []>} : vector<8x4xf32>, vector<4x288xf32>, vector<8x288xf32> -> vector<8x288xf32>
    %65 = arith.addf %61, %64 : vector<8x288xf32>
    %c0_73 = arith.constant 0 : index
    %c0_74 = arith.constant 0 : index
    %66 = vector.load %arg7[%c0_73, %c0_74] : memref<8x288xf32, #tpu.memory_space<vmem>>, vector<8x288xf32>
    tpu.vector_store %arg7[%c0_73, %c0_74], %65 {strides = array<i32>} : memref<8x288xf32, #tpu.memory_space<vmem>>, vector<8x288xf32>,
    %c0_75 = arith.constant 0 : index
    %c0_76 = arith.constant 0 : index
    %c38 = arith.constant 38 : index
    %67 = vector.load %arg4[%c0_75, %c0_76, %c38] : memref<1x4x342xf32, #tpu.memory_space<vmem>>, vector<1x4x288xf32>
    %68 = vector.shape_cast %67 : vector<1x4x288xf32> to vector<4x288xf32>
    %c0_77 = arith.constant 0 : index
    %c0_78 = arith.constant 0 : index
    %69 = vector.load %arg7[%c0_77, %c0_78] : memref<8x288xf32, #tpu.memory_space<vmem>>, vector<8x288xf32>
    %c8 = arith.constant 8 : index
    %c0_79 = arith.constant 0 : index
    %c0_80 = arith.constant 0 : index
    %70 = vector.load %arg3[%c8, %c0_79, %c0_80] : memref<9x8x4xf32, #tpu.memory_space<vmem>>, vector<1x8x4xf32>
    %71 = vector.shape_cast %70 : vector<1x8x4xf32> to vector<8x4xf32>
    %cst_81 = arith.constant dense<0.000000e+00> : vector<8x288xf32>
    %72 = tpu.matmul %71, %68, %cst_81 {dimension_numbers = #tpu.dot_dimension_numbers<[1], [0], [0], [1], [0, 0, 1, 1], [], []>} : vector<8x4xf32>, vector<4x288xf32>, vector<8x288xf32> -> vector<8x288xf32>
    %73 = arith.addf %69, %72 : vector<8x288xf32>
    %c0_82 = arith.constant 0 : index
    %c0_83 = arith.constant 0 : index
    %74 = vector.load %arg7[%c0_82, %c0_83] : memref<8x288xf32, #tpu.memory_space<vmem>>, vector<8x288xf32>
    tpu.vector_store %arg7[%c0_82, %c0_83], %73 {strides = array<i32>} : memref<8x288xf32, #tpu.memory_space<vmem>>, vector<8x288xf32>,
    %c0_i32_84 = arith.constant 0 : i32
    %75 = arith.cmpi eq, %arg2, %c0_i32_84 : i32
    %76 = arith.extui %75 : i1 to i32
    %c0_i32_85 = arith.constant 0 : i32
    %77 = arith.cmpi ne, %76, %c0_i32_85 : i32
    scf.if %77 {
      %c0_86 = arith.constant 0 : index
      %c0_87 = arith.constant 0 : index
      %78 = vector.load %arg5[%c0_86, %c0_87] : memref<8x1xf32, #tpu.memory_space<vmem>>, vector<8x1xf32>
      %c0_88 = arith.constant 0 : index
      %c0_89 = arith.constant 0 : index
      %79 = vector.load %arg7[%c0_88, %c0_89] : memref<8x288xf32, #tpu.memory_space<vmem>>, vector<8x16xf32>
      %80 = vector.broadcast %78 : vector<8x1xf32> to vector<8x16xf32>
      %81 = arith.addf %79, %80 : vector<8x16xf32>
      %cst_90 = arith.constant 0.000000e+00 : f32
      %82 = vector.broadcast %cst_90 : f32 to vector<8x16xf32>
      %83 = arith.maximumf %81, %82 : vector<8x16xf32>
      %cst_91 = arith.constant 6.000000e+00 : f32
      %84 = vector.broadcast %cst_91 : f32 to vector<8x16xf32>
      %85 = arith.minimumf %83, %84 : vector<8x16xf32>
      %c0_92 = arith.constant 0 : index
      %c0_93 = arith.constant 0 : index
      %c0_94 = arith.constant 0 : index
      %c0_95 = arith.constant 0 : index
      %86 = vector.load %arg6[%c0_92, %c0_93, %c0_94, %c0_95] : memref<1x8x16x16xf32, #tpu.memory_space<vmem>>, vector<1x8x1x16xf32>
      %87 = vector.shape_cast %86 : vector<1x8x1x16xf32> to vector<8x16xf32>
      %88 = vector.shape_cast %85 : vector<8x16xf32> to vector<1x8x1x16xf32>
      tpu.vector_store %arg6[%c0_92, %c0_93, %c0_94, %c0_95], %88 {strides = array<i32>} : memref<1x8x16x16xf32, #tpu.memory_space<vmem>>, vector<1x8x1x16xf32>,
      %c0_96 = arith.constant 0 : index
      %c18_97 = arith.constant 18 : index
      %89 = vector.load %arg7[%c0_96, %c18_97] : memref<8x288xf32, #tpu.memory_space<vmem>>, vector<8x16xf32>
      %90 = vector.broadcast %78 : vector<8x1xf32> to vector<8x16xf32>
      %91 = arith.addf %89, %90 : vector<8x16xf32>
      %cst_98 = arith.constant 0.000000e+00 : f32
      %92 = vector.broadcast %cst_98 : f32 to vector<8x16xf32>
      %93 = arith.maximumf %91, %92 : vector<8x16xf32>
      %cst_99 = arith.constant 6.000000e+00 : f32
      %94 = vector.broadcast %cst_99 : f32 to vector<8x16xf32>
      %95 = arith.minimumf %93, %94 : vector<8x16xf32>
      %c0_100 = arith.constant 0 : index
      %c0_101 = arith.constant 0 : index
      %c1_102 = arith.constant 1 : index
      %c0_103 = arith.constant 0 : index
      %96 = vector.load %arg6[%c0_100, %c0_101, %c1_102, %c0_103] : memref<1x8x16x16xf32, #tpu.memory_space<vmem>>, vector<1x8x1x16xf32>
      %97 = vector.shape_cast %96 : vector<1x8x1x16xf32> to vector<8x16xf32>
      %98 = vector.shape_cast %95 : vector<8x16xf32> to vector<1x8x1x16xf32>
      tpu.vector_store %arg6[%c0_100, %c0_101, %c1_102, %c0_103], %98 {strides = array<i32>} : memref<1x8x16x16xf32, #tpu.memory_space<vmem>>, vector<1x8x1x16xf32>,
      %c0_104 = arith.constant 0 : index
      %c36_105 = arith.constant 36 : index
      %99 = vector.load %arg7[%c0_104, %c36_105] : memref<8x288xf32, #tpu.memory_space<vmem>>, vector<8x16xf32>
      %100 = vector.broadcast %78 : vector<8x1xf32> to vector<8x16xf32>
      %101 = arith.addf %99, %100 : vector<8x16xf32>
      %cst_106 = arith.constant 0.000000e+00 : f32
      %102 = vector.broadcast %cst_106 : f32 to vector<8x16xf32>
      %103 = arith.maximumf %101, %102 : vector<8x16xf32>
      %cst_107 = arith.constant 6.000000e+00 : f32
      %104 = vector.broadcast %cst_107 : f32 to vector<8x16xf32>
      %105 = arith.minimumf %103, %104 : vector<8x16xf32>
      %c0_108 = arith.constant 0 : index
      %c0_109 = arith.constant 0 : index
      %c2_110 = arith.constant 2 : index
      %c0_111 = arith.constant 0 : index
      %106 = vector.load %arg6[%c0_108, %c0_109, %c2_110, %c0_111] : memref<1x8x16x16xf32, #tpu.memory_space<vmem>>, vector<1x8x1x16xf32>
      %107 = vector.shape_cast %106 : vector<1x8x1x16xf32> to vector<8x16xf32>
      %108 = vector.shape_cast %105 : vector<8x16xf32> to vector<1x8x1x16xf32>
      tpu.vector_store %arg6[%c0_108, %c0_109, %c2_110, %c0_111], %108 {strides = array<i32>} : memref<1x8x16x16xf32, #tpu.memory_space<vmem>>, vector<1x8x1x16xf32>,
      %c0_112 = arith.constant 0 : index
      %c54 = arith.constant 54 : index
      %109 = vector.load %arg7[%c0_112, %c54] : memref<8x288xf32, #tpu.memory_space<vmem>>, vector<8x16xf32>
      %110 = vector.broadcast %78 : vector<8x1xf32> to vector<8x16xf32>
      %111 = arith.addf %109, %110 : vector<8x16xf32>
      %cst_113 = arith.constant 0.000000e+00 : f32
      %112 = vector.broadcast %cst_113 : f32 to vector<8x16xf32>
      %113 = arith.maximumf %111, %112 : vector<8x16xf32>
      %cst_114 = arith.constant 6.000000e+00 : f32
      %114 = vector.broadcast %cst_114 : f32 to vector<8x16xf32>
      %115 = arith.minimumf %113, %114 : vector<8x16xf32>
      %c0_115 = arith.constant 0 : index
      %c0_116 = arith.constant 0 : index
      %c3_117 = arith.constant 3 : index
      %c0_118 = arith.constant 0 : index
      %116 = vector.load %arg6[%c0_115, %c0_116, %c3_117, %c0_118] : memref<1x8x16x16xf32, #tpu.memory_space<vmem>>, vector<1x8x1x16xf32>
      %117 = vector.shape_cast %116 : vector<1x8x1x16xf32> to vector<8x16xf32>
      %118 = vector.shape_cast %115 : vector<8x16xf32> to vector<1x8x1x16xf32>
      tpu.vector_store %arg6[%c0_115, %c0_116, %c3_117, %c0_118], %118 {strides = array<i32>} : memref<1x8x16x16xf32, #tpu.memory_space<vmem>>, vector<1x8x1x16xf32>,
      %c0_119 = arith.constant 0 : index
      %c72 = arith.constant 72 : index
      %119 = vector.load %arg7[%c0_119, %c72] : memref<8x288xf32, #tpu.memory_space<vmem>>, vector<8x16xf32>
      %120 = vector.broadcast %78 : vector<8x1xf32> to vector<8x16xf32>
      %121 = arith.addf %119, %120 : vector<8x16xf32>
      %cst_120 = arith.constant 0.000000e+00 : f32
      %122 = vector.broadcast %cst_120 : f32 to vector<8x16xf32>
      %123 = arith.maximumf %121, %122 : vector<8x16xf32>
      %cst_121 = arith.constant 6.000000e+00 : f32
      %124 = vector.broadcast %cst_121 : f32 to vector<8x16xf32>
      %125 = arith.minimumf %123, %124 : vector<8x16xf32>
      %c0_122 = arith.constant 0 : index
      %c0_123 = arith.constant 0 : index
      %c4_124 = arith.constant 4 : index
      %c0_125 = arith.constant 0 : index
      %126 = vector.load %arg6[%c0_122, %c0_123, %c4_124, %c0_125] : memref<1x8x16x16xf32, #tpu.memory_space<vmem>>, vector<1x8x1x16xf32>
      %127 = vector.shape_cast %126 : vector<1x8x1x16xf32> to vector<8x16xf32>
      %128 = vector.shape_cast %125 : vector<8x16xf32> to vector<1x8x1x16xf32>
      tpu.vector_store %arg6[%c0_122, %c0_123, %c4_124, %c0_125], %128 {strides = array<i32>} : memref<1x8x16x16xf32, #tpu.memory_space<vmem>>, vector<1x8x1x16xf32>,
      %c0_126 = arith.constant 0 : index
      %c90 = arith.constant 90 : index
      %129 = vector.load %arg7[%c0_126, %c90] : memref<8x288xf32, #tpu.memory_space<vmem>>, vector<8x16xf32>
      %130 = vector.broadcast %78 : vector<8x1xf32> to vector<8x16xf32>
      %131 = arith.addf %129, %130 : vector<8x16xf32>
      %cst_127 = arith.constant 0.000000e+00 : f32
      %132 = vector.broadcast %cst_127 : f32 to vector<8x16xf32>
      %133 = arith.maximumf %131, %132 : vector<8x16xf32>
      %cst_128 = arith.constant 6.000000e+00 : f32
      %134 = vector.broadcast %cst_128 : f32 to vector<8x16xf32>
      %135 = arith.minimumf %133, %134 : vector<8x16xf32>
      %c0_129 = arith.constant 0 : index
      %c0_130 = arith.constant 0 : index
      %c5_131 = arith.constant 5 : index
      %c0_132 = arith.constant 0 : index
      %136 = vector.load %arg6[%c0_129, %c0_130, %c5_131, %c0_132] : memref<1x8x16x16xf32, #tpu.memory_space<vmem>>, vector<1x8x1x16xf32>
      %137 = vector.shape_cast %136 : vector<1x8x1x16xf32> to vector<8x16xf32>
      %138 = vector.shape_cast %135 : vector<8x16xf32> to vector<1x8x1x16xf32>
      tpu.vector_store %arg6[%c0_129, %c0_130, %c5_131, %c0_132], %138 {strides = array<i32>} : memref<1x8x16x16xf32, #tpu.memory_space<vmem>>, vector<1x8x1x16xf32>,
      %c0_133 = arith.constant 0 : index
      %c108 = arith.constant 108 : index
      %139 = vector.load %arg7[%c0_133, %c108] : memref<8x288xf32, #tpu.memory_space<vmem>>, vector<8x16xf32>
      %140 = vector.broadcast %78 : vector<8x1xf32> to vector<8x16xf32>
      %141 = arith.addf %139, %140 : vector<8x16xf32>
      %cst_134 = arith.constant 0.000000e+00 : f32
      %142 = vector.broadcast %cst_134 : f32 to vector<8x16xf32>
      %143 = arith.maximumf %141, %142 : vector<8x16xf32>
      %cst_135 = arith.constant 6.000000e+00 : f32
      %144 = vector.broadcast %cst_135 : f32 to vector<8x16xf32>
      %145 = arith.minimumf %143, %144 : vector<8x16xf32>
      %c0_136 = arith.constant 0 : index
      %c0_137 = arith.constant 0 : index
      %c6_138 = arith.constant 6 : index
      %c0_139 = arith.constant 0 : index
      %146 = vector.load %arg6[%c0_136, %c0_137, %c6_138, %c0_139] : memref<1x8x16x16xf32, #tpu.memory_space<vmem>>, vector<1x8x1x16xf32>
      %147 = vector.shape_cast %146 : vector<1x8x1x16xf32> to vector<8x16xf32>
      %148 = vector.shape_cast %145 : vector<8x16xf32> to vector<1x8x1x16xf32>
      tpu.vector_store %arg6[%c0_136, %c0_137, %c6_138, %c0_139], %148 {strides = array<i32>} : memref<1x8x16x16xf32, #tpu.memory_space<vmem>>, vector<1x8x1x16xf32>,
      %c0_140 = arith.constant 0 : index
      %c126 = arith.constant 126 : index
      %149 = vector.load %arg7[%c0_140, %c126] : memref<8x288xf32, #tpu.memory_space<vmem>>, vector<8x16xf32>
      %150 = vector.broadcast %78 : vector<8x1xf32> to vector<8x16xf32>
      %151 = arith.addf %149, %150 : vector<8x16xf32>
      %cst_141 = arith.constant 0.000000e+00 : f32
      %152 = vector.broadcast %cst_141 : f32 to vector<8x16xf32>
      %153 = arith.maximumf %151, %152 : vector<8x16xf32>
      %cst_142 = arith.constant 6.000000e+00 : f32
      %154 = vector.broadcast %cst_142 : f32 to vector<8x16xf32>
      %155 = arith.minimumf %153, %154 : vector<8x16xf32>
      %c0_143 = arith.constant 0 : index
      %c0_144 = arith.constant 0 : index
      %c7_145 = arith.constant 7 : index
      %c0_146 = arith.constant 0 : index
      %156 = vector.load %arg6[%c0_143, %c0_144, %c7_145, %c0_146] : memref<1x8x16x16xf32, #tpu.memory_space<vmem>>, vector<1x8x1x16xf32>
      %157 = vector.shape_cast %156 : vector<1x8x1x16xf32> to vector<8x16xf32>
      %158 = vector.shape_cast %155 : vector<8x16xf32> to vector<1x8x1x16xf32>
      tpu.vector_store %arg6[%c0_143, %c0_144, %c7_145, %c0_146], %158 {strides = array<i32>} : memref<1x8x16x16xf32, #tpu.memory_space<vmem>>, vector<1x8x1x16xf32>,
      %c0_147 = arith.constant 0 : index
      %c144 = arith.constant 144 : index
      %159 = vector.load %arg7[%c0_147, %c144] : memref<8x288xf32, #tpu.memory_space<vmem>>, vector<8x16xf32>
      %160 = vector.broadcast %78 : vector<8x1xf32> to vector<8x16xf32>
      %161 = arith.addf %159, %160 : vector<8x16xf32>
      %cst_148 = arith.constant 0.000000e+00 : f32
      %162 = vector.broadcast %cst_148 : f32 to vector<8x16xf32>
      %163 = arith.maximumf %161, %162 : vector<8x16xf32>
      %cst_149 = arith.constant 6.000000e+00 : f32
      %164 = vector.broadcast %cst_149 : f32 to vector<8x16xf32>
      %165 = arith.minimumf %163, %164 : vector<8x16xf32>
      %c0_150 = arith.constant 0 : index
      %c0_151 = arith.constant 0 : index
      %c8_152 = arith.constant 8 : index
      %c0_153 = arith.constant 0 : index
      %166 = vector.load %arg6[%c0_150, %c0_151, %c8_152, %c0_153] : memref<1x8x16x16xf32, #tpu.memory_space<vmem>>, vector<1x8x1x16xf32>
      %167 = vector.shape_cast %166 : vector<1x8x1x16xf32> to vector<8x16xf32>
      %168 = vector.shape_cast %165 : vector<8x16xf32> to vector<1x8x1x16xf32>
      tpu.vector_store %arg6[%c0_150, %c0_151, %c8_152, %c0_153], %168 {strides = array<i32>} : memref<1x8x16x16xf32, #tpu.memory_space<vmem>>, vector<1x8x1x16xf32>,
      %c0_154 = arith.constant 0 : index
      %c162 = arith.constant 162 : index
      %169 = vector.load %arg7[%c0_154, %c162] : memref<8x288xf32, #tpu.memory_space<vmem>>, vector<8x16xf32>
      %170 = vector.broadcast %78 : vector<8x1xf32> to vector<8x16xf32>
      %171 = arith.addf %169, %170 : vector<8x16xf32>
      %cst_155 = arith.constant 0.000000e+00 : f32
      %172 = vector.broadcast %cst_155 : f32 to vector<8x16xf32>
      %173 = arith.maximumf %171, %172 : vector<8x16xf32>
      %cst_156 = arith.constant 6.000000e+00 : f32
      %174 = vector.broadcast %cst_156 : f32 to vector<8x16xf32>
      %175 = arith.minimumf %173, %174 : vector<8x16xf32>
      %c0_157 = arith.constant 0 : index
      %c0_158 = arith.constant 0 : index
      %c9 = arith.constant 9 : index
      %c0_159 = arith.constant 0 : index
      %176 = vector.load %arg6[%c0_157, %c0_158, %c9, %c0_159] : memref<1x8x16x16xf32, #tpu.memory_space<vmem>>, vector<1x8x1x16xf32>
      %177 = vector.shape_cast %176 : vector<1x8x1x16xf32> to vector<8x16xf32>
      %178 = vector.shape_cast %175 : vector<8x16xf32> to vector<1x8x1x16xf32>
      tpu.vector_store %arg6[%c0_157, %c0_158, %c9, %c0_159], %178 {strides = array<i32>} : memref<1x8x16x16xf32, #tpu.memory_space<vmem>>, vector<1x8x1x16xf32>,
      %c0_160 = arith.constant 0 : index
      %c180 = arith.constant 180 : index
      %179 = vector.load %arg7[%c0_160, %c180] : memref<8x288xf32, #tpu.memory_space<vmem>>, vector<8x16xf32>
      %180 = vector.broadcast %78 : vector<8x1xf32> to vector<8x16xf32>
      %181 = arith.addf %179, %180 : vector<8x16xf32>
      %cst_161 = arith.constant 0.000000e+00 : f32
      %182 = vector.broadcast %cst_161 : f32 to vector<8x16xf32>
      %183 = arith.maximumf %181, %182 : vector<8x16xf32>
      %cst_162 = arith.constant 6.000000e+00 : f32
      %184 = vector.broadcast %cst_162 : f32 to vector<8x16xf32>
      %185 = arith.minimumf %183, %184 : vector<8x16xf32>
      %c0_163 = arith.constant 0 : index
      %c0_164 = arith.constant 0 : index
      %c10 = arith.constant 10 : index
      %c0_165 = arith.constant 0 : index
      %186 = vector.load %arg6[%c0_163, %c0_164, %c10, %c0_165] : memref<1x8x16x16xf32, #tpu.memory_space<vmem>>, vector<1x8x1x16xf32>
      %187 = vector.shape_cast %186 : vector<1x8x1x16xf32> to vector<8x16xf32>
      %188 = vector.shape_cast %185 : vector<8x16xf32> to vector<1x8x1x16xf32>
      tpu.vector_store %arg6[%c0_163, %c0_164, %c10, %c0_165], %188 {strides = array<i32>} : memref<1x8x16x16xf32, #tpu.memory_space<vmem>>, vector<1x8x1x16xf32>,
      %c0_166 = arith.constant 0 : index
      %c198 = arith.constant 198 : index
      %189 = vector.load %arg7[%c0_166, %c198] : memref<8x288xf32, #tpu.memory_space<vmem>>, vector<8x16xf32>
      %190 = vector.broadcast %78 : vector<8x1xf32> to vector<8x16xf32>
      %191 = arith.addf %189, %190 : vector<8x16xf32>
      %cst_167 = arith.constant 0.000000e+00 : f32
      %192 = vector.broadcast %cst_167 : f32 to vector<8x16xf32>
      %193 = arith.maximumf %191, %192 : vector<8x16xf32>
      %cst_168 = arith.constant 6.000000e+00 : f32
      %194 = vector.broadcast %cst_168 : f32 to vector<8x16xf32>
      %195 = arith.minimumf %193, %194 : vector<8x16xf32>
      %c0_169 = arith.constant 0 : index
      %c0_170 = arith.constant 0 : index
      %c11 = arith.constant 11 : index
      %c0_171 = arith.constant 0 : index
      %196 = vector.load %arg6[%c0_169, %c0_170, %c11, %c0_171] : memref<1x8x16x16xf32, #tpu.memory_space<vmem>>, vector<1x8x1x16xf32>
      %197 = vector.shape_cast %196 : vector<1x8x1x16xf32> to vector<8x16xf32>
      %198 = vector.shape_cast %195 : vector<8x16xf32> to vector<1x8x1x16xf32>
      tpu.vector_store %arg6[%c0_169, %c0_170, %c11, %c0_171], %198 {strides = array<i32>} : memref<1x8x16x16xf32, #tpu.memory_space<vmem>>, vector<1x8x1x16xf32>,
      %c0_172 = arith.constant 0 : index
      %c216 = arith.constant 216 : index
      %199 = vector.load %arg7[%c0_172, %c216] : memref<8x288xf32, #tpu.memory_space<vmem>>, vector<8x16xf32>
      %200 = vector.broadcast %78 : vector<8x1xf32> to vector<8x16xf32>
      %201 = arith.addf %199, %200 : vector<8x16xf32>
      %cst_173 = arith.constant 0.000000e+00 : f32
      %202 = vector.broadcast %cst_173 : f32 to vector<8x16xf32>
      %203 = arith.maximumf %201, %202 : vector<8x16xf32>
      %cst_174 = arith.constant 6.000000e+00 : f32
      %204 = vector.broadcast %cst_174 : f32 to vector<8x16xf32>
      %205 = arith.minimumf %203, %204 : vector<8x16xf32>
      %c0_175 = arith.constant 0 : index
      %c0_176 = arith.constant 0 : index
      %c12 = arith.constant 12 : index
      %c0_177 = arith.constant 0 : index
      %206 = vector.load %arg6[%c0_175, %c0_176, %c12, %c0_177] : memref<1x8x16x16xf32, #tpu.memory_space<vmem>>, vector<1x8x1x16xf32>
      %207 = vector.shape_cast %206 : vector<1x8x1x16xf32> to vector<8x16xf32>
      %208 = vector.shape_cast %205 : vector<8x16xf32> to vector<1x8x1x16xf32>
      tpu.vector_store %arg6[%c0_175, %c0_176, %c12, %c0_177], %208 {strides = array<i32>} : memref<1x8x16x16xf32, #tpu.memory_space<vmem>>, vector<1x8x1x16xf32>,
      %c0_178 = arith.constant 0 : index
      %c234 = arith.constant 234 : index
      %209 = vector.load %arg7[%c0_178, %c234] : memref<8x288xf32, #tpu.memory_space<vmem>>, vector<8x16xf32>
      %210 = vector.broadcast %78 : vector<8x1xf32> to vector<8x16xf32>
      %211 = arith.addf %209, %210 : vector<8x16xf32>
      %cst_179 = arith.constant 0.000000e+00 : f32
      %212 = vector.broadcast %cst_179 : f32 to vector<8x16xf32>
      %213 = arith.maximumf %211, %212 : vector<8x16xf32>
      %cst_180 = arith.constant 6.000000e+00 : f32
      %214 = vector.broadcast %cst_180 : f32 to vector<8x16xf32>
      %215 = arith.minimumf %213, %214 : vector<8x16xf32>
      %c0_181 = arith.constant 0 : index
      %c0_182 = arith.constant 0 : index
      %c13 = arith.constant 13 : index
      %c0_183 = arith.constant 0 : index
      %216 = vector.load %arg6[%c0_181, %c0_182, %c13, %c0_183] : memref<1x8x16x16xf32, #tpu.memory_space<vmem>>, vector<1x8x1x16xf32>
      %217 = vector.shape_cast %216 : vector<1x8x1x16xf32> to vector<8x16xf32>
      %218 = vector.shape_cast %215 : vector<8x16xf32> to vector<1x8x1x16xf32>
      tpu.vector_store %arg6[%c0_181, %c0_182, %c13, %c0_183], %218 {strides = array<i32>} : memref<1x8x16x16xf32, #tpu.memory_space<vmem>>, vector<1x8x1x16xf32>,
      %c0_184 = arith.constant 0 : index
      %c252 = arith.constant 252 : index
      %219 = vector.load %arg7[%c0_184, %c252] : memref<8x288xf32, #tpu.memory_space<vmem>>, vector<8x16xf32>
      %220 = vector.broadcast %78 : vector<8x1xf32> to vector<8x16xf32>
      %221 = arith.addf %219, %220 : vector<8x16xf32>
      %cst_185 = arith.constant 0.000000e+00 : f32
      %222 = vector.broadcast %cst_185 : f32 to vector<8x16xf32>
      %223 = arith.maximumf %221, %222 : vector<8x16xf32>
      %cst_186 = arith.constant 6.000000e+00 : f32
      %224 = vector.broadcast %cst_186 : f32 to vector<8x16xf32>
      %225 = arith.minimumf %223, %224 : vector<8x16xf32>
      %c0_187 = arith.constant 0 : index
      %c0_188 = arith.constant 0 : index
      %c14 = arith.constant 14 : index
      %c0_189 = arith.constant 0 : index
      %226 = vector.load %arg6[%c0_187, %c0_188, %c14, %c0_189] : memref<1x8x16x16xf32, #tpu.memory_space<vmem>>, vector<1x8x1x16xf32>
      %227 = vector.shape_cast %226 : vector<1x8x1x16xf32> to vector<8x16xf32>
      %228 = vector.shape_cast %225 : vector<8x16xf32> to vector<1x8x1x16xf32>
      tpu.vector_store %arg6[%c0_187, %c0_188, %c14, %c0_189], %228 {strides = array<i32>} : memref<1x8x16x16xf32, #tpu.memory_space<vmem>>, vector<1x8x1x16xf32>,
      %c0_190 = arith.constant 0 : index
      %c270 = arith.constant 270 : index
      %229 = vector.load %arg7[%c0_190, %c270] : memref<8x288xf32, #tpu.memory_space<vmem>>, vector<8x16xf32>
      %230 = vector.broadcast %78 : vector<8x1xf32> to vector<8x16xf32>
      %231 = arith.addf %229, %230 : vector<8x16xf32>
      %cst_191 = arith.constant 0.000000e+00 : f32
      %232 = vector.broadcast %cst_191 : f32 to vector<8x16xf32>
      %233 = arith.maximumf %231, %232 : vector<8x16xf32>
      %cst_192 = arith.constant 6.000000e+00 : f32
      %234 = vector.broadcast %cst_192 : f32 to vector<8x16xf32>
      %235 = arith.minimumf %233, %234 : vector<8x16xf32>
      %c0_193 = arith.constant 0 : index
      %c0_194 = arith.constant 0 : index
      %c15 = arith.constant 15 : index
      %c0_195 = arith.constant 0 : index
      %236 = vector.load %arg6[%c0_193, %c0_194, %c15, %c0_195] : memref<1x8x16x16xf32, #tpu.memory_space<vmem>>, vector<1x8x1x16xf32>
      %237 = vector.shape_cast %236 : vector<1x8x1x16xf32> to vector<8x16xf32>
      %238 = vector.shape_cast %235 : vector<8x16xf32> to vector<1x8x1x16xf32>
      tpu.vector_store %arg6[%c0_193, %c0_194, %c15, %c0_195], %238 {strides = array<i32>} : memref<1x8x16x16xf32, #tpu.memory_space<vmem>>, vector<1x8x1x16xf32>,
    } else {
    }
    return
  }
  func.func @transform_0(%arg0: i32, %arg1: i32, %arg2: i32) -> (i32, i32, i32) {
    %c0_i32 = arith.constant 0 : i32
    %c0_i32_0 = arith.constant 0 : i32
    return %c0_i32, %arg1, %arg2 : i32, i32, i32
  }
  func.func @transform_1(%arg0: i32, %arg1: i32, %arg2: i32) -> (i32, i32, i32) {
    %c0_i32 = arith.constant 0 : i32
    %c0_i32_0 = arith.constant 0 : i32
    return %arg0, %arg2, %c0_i32 : i32, i32, i32
  }
  func.func @transform_2(%arg0: i32, %arg1: i32, %arg2: i32) -> (i32, i32) {
    %c0_i32 = arith.constant 0 : i32
    %c0_i32_0 = arith.constant 0 : i32
    return %arg1, %c0_i32 : i32, i32
  }
  func.func @transform_3(%arg0: i32, %arg1: i32, %arg2: i32) -> (i32, i32, i32, i32) {
    %c0_i32 = arith.constant 0 : i32
    %c0_i32_0 = arith.constant 0 : i32
    %c0_i32_1 = arith.constant 0 : i32
    return %arg0, %arg1, %c0_i32, %c0_i32_0 : i32, i32, i32, i32
  }
}

</mosaic_0001>

<bundles_post_ra>
// kernel: basic_conv2d.1
= control target key start
LH: loop header
LB: loop body
LE: loop exit
PB: predicated region body
PF: predicated region fallthrough
CT: control target
= control target key end

     0   :  { %8 = vsyncpa [#allocation4], 0  ;;  %s3349_s0 = inlined_call_operand.vmem [shape: f32[9,8,4], index: 0, kind: input, shape index: {}]   ;;  %s3350_s1 = inlined_call_operand.vmem [shape: f32[2,4,342], index: 1, kind: input, shape index: {}]   ;;  %s3351_s2 = inlined_call_operand.vmem [shape: f32[8,1], index: 2, kind: input, shape index: {}]   ;;  %s3352_s3 = inlined_call_operand.hbm [shape: f32[2,8,16,16], index: 3, kind: output, shape index: {}]  }
   0x1   :  { %10 = vsyncpa [#allocation4 + $0x1], 0  ;;  %s2481_s12 = smov 0   ;;  %s2483_s13 = smov 0  }
   0x2   :  { %s2485_s14 = smov 0   ;;  %s2487_s15 = smov 0  }
   0x3   :  { %s2489_s16 = smov 0   ;;  %s2491_s17 = smov 0  }
   0x4 LB: > { %s2197_s18 = sadd.s32 4294967295, %s2434_s17   ;;  %s2198_s19 = sadd.s32 4294967294, %s2434_s17   ;;  %s2434_s17 = sphi %s2491_s17, %s16_s17   ;;  %s2430_s16 = sphi %s2489_s16, %s3359_s16   ;;  %s2426_s15 = sphi %s2487_s15, %s3358_s15   ;;  %s2422_s14 = sphi %s2485_s14, %s3357_s14   ;;  %s2418_s13 = sphi %s2483_s13, %s3356_s13   ;;  %s2414_s12 = sphi %s2481_s12, %s3355_s12  }
   0x5   : > { %s35_s20 = sadd.s32 1, %s2430_s16  ;;  %s126_s21 = sadd.s32 1, %s2422_s14 }
   0x6   : > { %p37_p0 = scmp.ge.s32.totalorder %s35_s20, 2  ;;  %p136_p1 = scmp.ne.s32.totalorder %s2422_s14, %s2418_s13 }
   0x7   : > { %p137_p2 = scmp.eq.s32.totalorder %s2197_s18, 1  ;;  %p142_p3 = scmp.ne.s32.totalorder %s2418_s13, %s2414_s12 }
   0x8   : > { %s3361_s20 = smov (%p37_p0, %s35_s20), 0  ;;  %p143_p5 = scmp.eq.s32.totalorder %s2198_s19, 1 }
   0x9   : > { %p2521_p4 = por %p137_p2, %p136_p1  ;;  %s121_s23 = ssub.s32 %s2430_s16, %s3361_s20 }
   0xa   : > { %p2203_p6 = scmp.ge.s32.totalorder %s2434_s17, 1  ;;  %p124_p7 = scmp.eq.s32.totalorder %s121_s23, 0 }
   0xb   : > { %p2528_p8 = por %p143_p5, %p142_p3  ;;  %p190_p9 = scmp.lt.s32.totalorder %s2434_s17, 3 }
   0xc   : > { %s2534_s25 = scalar_select %p124_p7, %s2422_s14, %s126_s21  }
   0xd   : > { %p191_p10 = pnand %p2203_p6, %p190_p9 }
   0xe   : > { %p236_p11 = scmp.lt.s32.totalorder (!%p191_p10), %s2426_s15, 1  ;;  %s2437_s6 = smov (!%p191_p10), 127  }
   0xf   : > { %194 = sbr.rel (%p191_p10) target bundleno = 833 (0x341), region = 32  ;;  %s2438_s7 = smov (!%p191_p10), 126  }
  0x10   : > { %s2439_s8 = smov (!%p191_p10), 110   ;;  %s2440_s9 = smov (!%p191_p10), 109  }
  0x11   : > { %s2441_s10 = smov (!%p191_p10), 108   ;;  %s2442_s11 = smov (!%p191_p10), 92  }
  0x12   : > { %s2443_s18 = smov (!%p191_p10), 91   ;;  %s2444_s19 = smov (!%p191_p10), 90  }
  0x13   : > { %s226_s27 = sand.u32 (!%p191_p10), 1, %s2418_s13   ;;  %s2446_s30 = smov (!%p191_p10), 76  }
  0x14   : > { %v1145_v0 = vld [vmem:[%s3351_s2] sm:$0xff]  ;;  %v2436_v1 = vmov 0   ;;  %s237_s28 = scalar_select %p236_p11, %s2426_s15, 1  ;;  %vm276_vm0 = vcmask 1043456   ;;  %vm272_vm1 = vcmask 31744   ;;  %v2212_v44 = vld [vmem:[%s3349_s0 + $0x8] sm:$0xff] }
  0x15   : > { %2355 = vset.pattern.permute.xlu0 %v2436_v1  ;;  %v263_v39 = vld [vmem:[%s3349_s0] sm:$0xff]  ;;  %vm371_vm2 = vcmask 1039360   ;;  %vm470_vm3 = vcmask 1031168   ;;  %v2219_v53 = vld [vmem:[%s3349_s0 + $0x10] sm:$0xff]  ;;  %vm569_vm4 = vcmask 900096   ;;  %v2226_v59 = vld [vmem:[%s3349_s0 + $0x18] sm:$0xff] }
  0x16   : > { %1149 = vperm.xlu0 %2355, %v1145_v0   ;;  %s2274_s29 = smul.u32 12, %s237_s28  ;;  %vm668_vm5 = vcmask 891904   ;;  %v2233_v1 = vld [vmem:[%s3349_s0 + $0x20] sm:$0xff]  ;;  %vm256_vm6 = vcmask 261120   ;;  %vm767_vm7 = vcmask 883712   ;;  %vm866_vm8 = vcmask 752640  }
  0x17   : > { %vm965_vm9 = vcmask 744448   ;;  %vm1064_vm10 = vcmask 736256   ;;  %s2204_s28 = sshll.u32 %s226_s27, 7  ;;  %vm1170_vm11 = vcmask 122880   ;;  %s2447_s4 = smov 94   ;;  %vm1502_vm12 = vcmask 1040384  }
  0x18   : > { %s2544_s5 = scalar_lea.vmem %s3350_s1, %s2274_s29  ;;  %s2685_s29 = scalar_lea.vmem [#allocation3], %s2204_s28  ;;  %vm1507_vm13 = vcmask 1042434   ;;  %vm1510_vm14 = vcmask 1043459   ;;  %vm1504_vm15 = vcmask 1041409  }
  0x19   : > { %v259_v2 = vld [vmem:[%s2544_s5 + $0x8] sm:$0xf]  ;;  %v2548_v3 = vld [vmem:[%s2544_s5] sm:$0xff]  ;;  %s2455_s21 = smov 38   ;;  %s2456_s23 = smov 2  }
  0x1a   : > { %268 = vst [vmem:[#allocation1 + $0x10] ss:$2 sm:$0xff] %v259_v2  ;;  %v351_v4 = vld [vmem:[%s2544_s5 + $0x8] sm:$0xf]  ;;  %s2273_s26 = sshll.u32 %s2426_s15, 7 }
  0x1b   : > { %266 = vst [vmem:[#allocation1] ss:$2 sm:$0xff] %v2548_v3  ;;  %v450_v8 = vld [vmem:[%s2544_s5 + $0x8] sm:$0xf] }
  0x1c   : > { %v549_v12 = vld [vmem:[%s2544_s5 + $0x8] sm:$0xf] }
  0x1d   : > { %v648_v16 = vld [vmem:[%s2544_s5 + $0x8] sm:$0xf] }
  0x1e   : > { %v747_v20 = vld [vmem:[%s2544_s5 + $0x8] sm:$0xf] }
  0x1f   : > { %v846_v24 = vld [vmem:[%s2544_s5 + $0x8] sm:$0xf] }
  0x20   : > { %v945_v28 = vld [vmem:[%s2544_s5 + $0x8] sm:$0xf] }
  0x21   : > { %v2552_v5 = vld.sshfl [vmem:[#allocation1 + $0x10] sm:$0xff pattern:$0x75316420]  ;;  %v1044_v32 = vld [vmem:[%s2544_s5 + $0x8] sm:$0xf]  ;;  %s2448_s5 = smov 112  }
  0x22   : > { %361 = vst [vmem:[#allocation1 + $0x10] ss:$2 sm:$0xff] %v351_v4  ;;  %v2554_v6 = vld.sshfl [vmem:[#allocation1] sm:$0xff pattern:$0x75316420]  ;;  %2210 = vmatpush.msk.msra.mxu2 %vm276_vm0, %v2552_v5 }
  0x23   : > { %v2556_v7 = vld.sshfl [vmem:[#allocation1 + $0x8] sm:$0xff pattern:$0x75316420]  ;;  %2206 = vmatpush.msk.msra.mxu0 %vm276_vm0, %v2554_v6  ;;  %2211 = vmatmul.msk.f32.vlgmr.msra.gmra.mxu2 %vm272_vm1, %v263_v39 }
  0x24   : > { %359 = vst [vmem:[#allocation1] ss:$2 sm:$0xff] %v2548_v3  ;;  %2208 = vmatpush.msk.msra.mxu1 %vm276_vm0, %v2556_v7  ;;  %2207 = vmatmul.msk.f32.vlgmr.msra.gmra.mxu0 %vm272_vm1, %v263_v39  ;;  %v2240_v6 = vld [vmem:[%s3349_s0 + $0x28] sm:$0xff] }
  0x25   : > { %2209 = vmatmul.msk.f32.vlgmr.msra.gmra.mxu1 %vm272_vm1, %v263_v39 }
  0x29   : > { %v364_v9 = vld.sshfl [vmem:[#allocation1 + $0x10] sm:$0xff pattern:$0x75316420] }
  0x2a   : > { %369 = vrot.lane.b32.xlu1 %v364_v9, %s2437_s6  ;;  %460 = vst [vmem:[#allocation1 + $0x10] ss:$2 sm:$0xff] %v450_v8 }
  0x2b   : > { %v362_v10 = vld.sshfl [vmem:[#allocation1] sm:$0xff pattern:$0x75316420]  ;;  %v363_v11 = vld.sshfl [vmem:[#allocation1 + $0x8] sm:$0xff pattern:$0x75316420] }
  0x2c   : > { %365 = vrot.lane.b32.xlu0 %v362_v10, %s2437_s6  ;;  %458 = vst [vmem:[#allocation1] ss:$2 sm:$0xff] %v2548_v3 }
  0x31   : > { %v463_v13 = vld.sshfl [vmem:[#allocation1 + $0x10] sm:$0xff pattern:$0x75316420] }
  0x32   : > { %559 = vst [vmem:[#allocation1 + $0x10] ss:$2 sm:$0xff] %v549_v12  ;;  %v2247_v12 = vld [vmem:[%s3349_s0 + $0x30] sm:$0xff] }
  0x33   : > { %v461_v14 = vld.sshfl [vmem:[#allocation1] sm:$0xff pattern:$0x75316420]  ;;  %v462_v15 = vld.sshfl [vmem:[#allocation1 + $0x8] sm:$0xff pattern:$0x75316420] }
  0x34   : > { %367 = vrot.lane.b32.xlu0 %v363_v11, %s2437_s6  ;;  %464 = vrot.lane.b32.xlu1 %v461_v14, %s2438_s7  ;;  %557 = vst [vmem:[#allocation1] ss:$2 sm:$0xff] %v2548_v3  ;;  %s2449_s6 = smov 22  }
  0x35   : > { %466 = vrot.lane.b32.xlu2 %v462_v15, %s2438_s7 }
  0x39   : > { %v562_v17 = vld.sshfl [vmem:[#allocation1 + $0x10] sm:$0xff pattern:$0x75316420] }
  0x3a   : > { %658 = vst [vmem:[#allocation1 + $0x10] ss:$2 sm:$0xff] %v648_v16 }
  0x3b   : > { %v561_v18 = vld.sshfl [vmem:[#allocation1 + $0x8] sm:$0xff pattern:$0x75316420]  ;;  %v560_v19 = vld.sshfl [vmem:[#allocation1] sm:$0xff pattern:$0x75316420] }
  0x3c   : > { %565 = vrot.lane.b32.xlu1 %v561_v18, %s2439_s8  ;;  %563 = vrot.lane.b32.xlu0 %v560_v19, %s2439_s8  ;;  %656 = vst [vmem:[#allocation1] ss:$2 sm:$0xff] %v2548_v3 }
  0x3d   : > { %468 = vrot.lane.b32.xlu2 %v463_v13, %s2438_s7  ;;  %s2450_s7 = smov 40  }
  0x41   : > { %v661_v21 = vld.sshfl [vmem:[#allocation1 + $0x10] sm:$0xff pattern:$0x75316420] }
  0x42   : > { %757 = vst [vmem:[#allocation1 + $0x10] ss:$2 sm:$0xff] %v747_v20 }
  0x43   : > { %v660_v22 = vld.sshfl [vmem:[#allocation1 + $0x8] sm:$0xff pattern:$0x75316420]  ;;  %v659_v23 = vld.sshfl [vmem:[#allocation1] sm:$0xff pattern:$0x75316420] }
  0x44   : > { %664 = vrot.lane.b32.xlu1 %v660_v22, %s2440_s9  ;;  %662 = vrot.lane.b32.xlu0 %v659_v23, %s2440_s9  ;;  %755 = vst [vmem:[#allocation1] ss:$2 sm:$0xff] %v2548_v3 }
  0x45   : > { %567 = vrot.lane.b32.xlu2 %v562_v17, %s2439_s8  ;;  %v2254_v17 = vld [vmem:[%s3349_s0 + $0x38] sm:$0xff] }
  0x49   : > { %v760_v25 = vld.sshfl [vmem:[#allocation1 + $0x10] sm:$0xff pattern:$0x75316420] }
  0x4a   : > { %856 = vst [vmem:[#allocation1 + $0x10] ss:$2 sm:$0xff] %v846_v24 }
  0x4b   : > { %v759_v26 = vld.sshfl [vmem:[#allocation1 + $0x8] sm:$0xff pattern:$0x75316420]  ;;  %v758_v27 = vld.sshfl [vmem:[#allocation1] sm:$0xff pattern:$0x75316420] }
  0x4c   : > { %763 = vrot.lane.b32.xlu1 %v759_v26, %s2441_s10  ;;  %761 = vrot.lane.b32.xlu0 %v758_v27, %s2441_s10  ;;  %854 = vst [vmem:[#allocation1] ss:$2 sm:$0xff] %v2548_v3 }
  0x4d   : > { %666 = vrot.lane.b32.xlu2 %v661_v21, %s2440_s9  ;;  %v2261_v21 = vld [vmem:[%s3349_s0 + $0x40] sm:$0xff]  ;;  %s2451_s9 = smov 58  }
  0x51   : > { %v859_v29 = vld.sshfl [vmem:[#allocation1 + $0x10] sm:$0xff pattern:$0x75316420] }
  0x52   : > { %955 = vst [vmem:[#allocation1 + $0x10] ss:$2 sm:$0xff] %v945_v28 }
  0x53   : > { %v858_v30 = vld.sshfl [vmem:[#allocation1 + $0x8] sm:$0xff pattern:$0x75316420]  ;;  %v857_v31 = vld.sshfl [vmem:[#allocation1] sm:$0xff pattern:$0x75316420] }
  0x54   : > { %862 = vrot.lane.b32.xlu1 %v858_v30, %s2442_s11  ;;  %860 = vrot.lane.b32.xlu0 %v857_v31, %s2442_s11  ;;  %953 = vst [vmem:[#allocation1] ss:$2 sm:$0xff] %v2548_v3 }
  0x55   : > { %765 = vrot.lane.b32.xlu2 %v760_v25, %s2441_s10  ;;  %s2452_s10 = smov 56  }
  0x59   : > { %v958_v33 = vld.sshfl [vmem:[#allocation1 + $0x10] sm:$0xff pattern:$0x75316420] }
  0x5a   : > { %1054 = vst [vmem:[#allocation1 + $0x10] ss:$2 sm:$0xff] %v1044_v32 }
  0x5b   : > { %v957_v34 = vld.sshfl [vmem:[#allocation1 + $0x8] sm:$0xff pattern:$0x75316420]  ;;  %v956_v35 = vld.sshfl [vmem:[#allocation1] sm:$0xff pattern:$0x75316420] }
  0x5c   : > { %961 = vrot.lane.b32.xlu1 %v957_v34, %s2443_s18  ;;  %959 = vrot.lane.b32.xlu0 %v956_v35, %s2443_s18  ;;  %1052 = vst [vmem:[#allocation1] ss:$2 sm:$0xff] %v2548_v3  ;;  %v2445_v3 = vmov 0.0  }
  0x5d   : > { %864 = vrot.lane.b32.xlu2 %v859_v29, %s2442_s11  ;;  %257 = vst.msk [vmem:[#allocation2 + $0x10] sm:$0xff] %vm256_vm6, %v2445_v3 }
  0x61   : > { %v1057_v38 = vld.sshfl [vmem:[#allocation1 + $0x10] sm:$0xff pattern:$0x75316420] }
  0x63   : > { %v1056_v36 = vld.sshfl [vmem:[#allocation1 + $0x8] sm:$0xff pattern:$0x75316420]  ;;  %v1055_v37 = vld.sshfl [vmem:[#allocation1] sm:$0xff pattern:$0x75316420] }
  0x64   : > { %1060 = vrot.lane.b32.xlu1 %v1056_v36, %s2444_s19  ;;  %1058 = vrot.lane.b32.xlu0 %v1055_v37, %s2444_s19  ;;  %v262_v26 = vld [vmem:[#allocation2 + $0x10] sm:$0xff] }
  0x65   : > { %963 = vrot.lane.b32.xlu2 %v958_v33, %s2443_s18  ;;  %s2453_s18 = smov 74  }
  0x6d   : > { %1062 = vrot.lane.b32.xlu2 %v1057_v38, %s2444_s19  ;;  %s2454_s19 = smov 20  }
  0x88   : > { %v2591_v41 = vpop.permute.xlu0 %1149 }
  0x8f   : > { %v467_v40 = vpop.permute.xlu2 %466 }
  0x97   : > { %v469_v42 = vpop.permute.xlu2 %468 }
  0x98   : > { %v472_v54 = vsel %vm470_vm3, %v467_v40, %v469_v42 }
  0x9c   : > { %v370_v43 = vpop.permute.xlu1 %369 }
  0x9d   : > { %2217 = vmatpush.msk.msrb.mxu1 %vm276_vm0, %v370_v43 }
  0x9e   : > { %v366_v45 = vpop.permute.xlu0 %365  ;;  %2218 = vmatmul.msk.f32.vlgmr.msrb.gmra.mxu1 %vm272_vm1, %v2212_v44 }
  0x9f   : > { %v568_v46 = vpop.permute.xlu2 %567 }
  0xa1   : > { %v300_v33 = vpop.f32.mrf.mxu0 }
  0xa2   : > { %v320_v29 = vpop.f32.mrf.mxu1 }
  0xa6   : > { %v368_v47 = vpop.permute.xlu0 %367  ;;  %v465_v48 = vpop.permute.xlu1 %464 }
  0xa7   : > { %v372_v49 = vsel %vm371_vm2, %v366_v45, %v368_v47  ;;  %v373_v50 = vsel %vm371_vm2, %v368_v47, %v370_v43  ;;  %v471_v51 = vsel %vm470_vm3, %v465_v48, %v467_v40  ;;  %v667_v52 = vpop.permute.xlu2 %666  ;;  %v340_v27 = vpop.f32.mrf.mxu2  ;;  %vm1519_vm2 = vcmask 1046534  }
  0xa8   : > { %2213 = vmatpush.msk.msra.mxu3 %vm276_vm0, %v372_v49  ;;  %2215 = vmatpush.msk.msrb.mxu0 %vm276_vm0, %v373_v50  ;;  %v345_v28 = vadd.f32 %v340_v27, %v262_v26  ;;  %vm1513_vm3 = vcmask 1044484  }
  0xa9   : > { %2220 = vmatpush.msk.msrb.mxu2 %vm276_vm0, %v471_v51  ;;  %2214 = vmatmul.msk.f32.vlgmr.msra.gmra.mxu3 %vm272_vm1, %v2212_v44 }
  0xaa   : > { %2222 = vmatpush.msk.msrb.mxu3 %vm276_vm0, %v472_v54  ;;  %2224 = vmatpush.msk.msra.mxu0 %vm276_vm0, %v469_v42  ;;  %349 = vst.msk [vmem:[#allocation2 + $0x10] sm:$0xff] %vm256_vm6, %v345_v28 }
  0xab   : > { %2216 = vmatmul.msk.f32.vlgmr.msrb.gmra.mxu0 %vm272_vm1, %v2212_v44  ;;  %2221 = vmatmul.msk.f32.vlgmr.msrb.gmra.mxu2 %vm272_vm1, %v2219_v53 }
  0xac   : > { %2231 = vmatpush.msk.msra.mxu3 %vm276_vm0, %v568_v46 }
  0xae   : > { %v566_v55 = vpop.permute.xlu1 %565  ;;  %v564_v56 = vpop.permute.xlu0 %563 }
  0xaf   : > { %v571_v57 = vsel %vm569_vm4, %v566_v55, %v568_v46  ;;  %v570_v58 = vsel %vm569_vm4, %v564_v56, %v566_v55  ;;  %v766_v60 = vpop.permute.xlu2 %765  ;;  %vm1522_vm4 = vcmask 1046528  }
  0xb0   : > { %2227 = vmatpush.msk.msra.mxu1 %vm276_vm0, %v570_v58  ;;  %2229 = vmatpush.msk.msra.mxu2 %vm276_vm0, %v571_v57 }
  0xb1   : > { %2223 = vmatmul.msk.f32.vlgmr.msrb.gmra.mxu3 %vm272_vm1, %v2219_v53  ;;  %2228 = vmatmul.msk.f32.vlgmr.msra.gmra.mxu1 %vm272_vm1, %v2226_v59  ;;  %v354_v30 = vld [vmem:[#allocation2 + $0x10] sm:$0xff] }
  0xb2   : > { %2238 = vmatpush.msk.msrb.mxu2 %vm276_vm0, %v667_v52 }
  0xb3   : > { %2225 = vmatmul.msk.f32.vlgmr.msra.gmra.mxu0 %vm272_vm1, %v2219_v53  ;;  %2230 = vmatmul.msk.f32.vlgmr.msra.gmra.mxu2 %vm272_vm1, %v2226_v59 }
  0xb6   : > { %v665_v61 = vpop.permute.xlu1 %664  ;;  %v663_v62 = vpop.permute.xlu0 %662 }
  0xb7   : > { %v670_v63 = vsel %vm668_vm5, %v665_v61, %v667_v52  ;;  %v669_v0 = vsel %vm668_vm5, %v663_v62, %v665_v61  ;;  %v865_v2 = vpop.permute.xlu2 %864  ;;  %vm1573_vm5 = vcmask 15360  }
  0xb8   : > { %2234 = vmatpush.msk.msrb.mxu0 %vm276_vm0, %v669_v0  ;;  %2236 = vmatpush.msk.msrb.mxu1 %vm276_vm0, %v670_v63 }
  0xb9   : > { %2232 = vmatmul.msk.f32.vlgmr.msra.gmra.mxu3 %vm272_vm1, %v2226_v59  ;;  %2237 = vmatmul.msk.f32.vlgmr.msrb.gmra.mxu1 %vm272_vm1, %v2233_v1 }
  0xba   : > { %2245 = vmatpush.msk.msra.mxu1 %vm276_vm0, %v766_v60 }
  0xbb   : > { %2239 = vmatmul.msk.f32.vlgmr.msrb.gmra.mxu2 %vm272_vm1, %v2233_v1  ;;  %2235 = vmatmul.msk.f32.vlgmr.msrb.gmra.mxu0 %vm272_vm1, %v2233_v1 }
  0xbe   : > { %v764_v4 = vpop.permute.xlu1 %763  ;;  %v762_v5 = vpop.permute.xlu0 %761 }
  0xbf   : > { %v769_v7 = vsel %vm767_vm7, %v764_v4, %v766_v60  ;;  %v768_v8 = vsel %vm767_vm7, %v762_v5, %v764_v4  ;;  %v964_v9 = vpop.permute.xlu2 %963 }
  0xc0   : > { %2241 = vmatpush.msk.msrb.mxu3 %vm276_vm0, %v768_v8  ;;  %2243 = vmatpush.msk.msra.mxu0 %vm276_vm0, %v769_v7 }
  0xc1   : > { %2242 = vmatmul.msk.f32.vlgmr.msrb.gmra.mxu3 %vm272_vm1, %v2240_v6  ;;  %2246 = vmatmul.msk.f32.vlgmr.msra.gmra.mxu1 %vm272_vm1, %v2240_v6 }
  0xc2   : > { %2252 = vmatpush.msk.msrb.mxu0 %vm276_vm0, %v865_v2 }
  0xc3   : > { %2244 = vmatmul.msk.f32.vlgmr.msra.gmra.mxu0 %vm272_vm1, %v2240_v6 }
  0xc6   : > { %v863_v10 = vpop.permute.xlu1 %862  ;;  %v861_v11 = vpop.permute.xlu0 %860 }
  0xc7   : > { %v868_v13 = vsel %vm866_vm8, %v863_v10, %v865_v2  ;;  %v867_v14 = vsel %vm866_vm8, %v861_v11, %v863_v10  ;;  %v1063_v20 = vpop.permute.xlu2 %1062 }
  0xc8   : > { %2248 = vmatpush.msk.msra.mxu2 %vm276_vm0, %v867_v14  ;;  %2250 = vmatpush.msk.msra.mxu3 %vm276_vm0, %v868_v13 }
  0xc9   : > { %2251 = vmatmul.msk.f32.vlgmr.msra.gmra.mxu3 %vm272_vm1, %v2247_v12  ;;  %2249 = vmatmul.msk.f32.vlgmr.msra.gmra.mxu2 %vm272_vm1, %v2247_v12 }
  0xca   : > { %2259 = vmatpush.msk.msrb.mxu3 %vm276_vm0, %v964_v9 }
  0xcb   : > { %2253 = vmatmul.msk.f32.vlgmr.msrb.gmra.mxu0 %vm272_vm1, %v2247_v12 }
  0xce   : > { %v962_v15 = vpop.permute.xlu1 %961  ;;  %v960_v16 = vpop.permute.xlu0 %959 }
  0xcf   : > { %v967_v18 = vsel %vm965_vm9, %v962_v15, %v964_v9  ;;  %v966_v19 = vsel %vm965_vm9, %v960_v16, %v962_v15 }
  0xd0   : > { %2255 = vmatpush.msk.msrb.mxu1 %vm276_vm0, %v966_v19  ;;  %2257 = vmatpush.msk.msrb.mxu2 %vm276_vm0, %v967_v18 }
  0xd1   : > { %2260 = vmatmul.msk.f32.vlgmr.msrb.gmra.mxu3 %vm272_vm1, %v2254_v17  ;;  %2258 = vmatmul.msk.f32.vlgmr.msrb.gmra.mxu2 %vm272_vm1, %v2254_v17 }
  0xd2   : > { %2266 = vmatpush.msk.msra.mxu2 %vm276_vm0, %v1063_v20  ;;  %2256 = vmatmul.msk.f32.vlgmr.msrb.gmra.mxu1 %vm272_vm1, %v2254_v17 }
  0xd6   : > { %v1061_v22 = vpop.permute.xlu1 %1060  ;;  %v1059_v23 = vpop.permute.xlu0 %1058 }
  0xd7   : > { %v1066_v24 = vsel %vm1064_vm10, %v1061_v22, %v1063_v20  ;;  %v1065_v25 = vsel %vm1064_vm10, %v1059_v23, %v1061_v22 }
  0xd8   : > { %2262 = vmatpush.msk.msra.mxu0 %vm276_vm0, %v1065_v25  ;;  %2264 = vmatpush.msk.msra.mxu1 %vm276_vm0, %v1066_v24  ;;  %vm1516_vm0 = vcmask 1045509  }
  0xd9   : > { %2267 = vmatmul.msk.f32.vlgmr.msra.gmra.mxu2 %vm272_vm1, %v2261_v21  ;;  %2263 = vmatmul.msk.f32.vlgmr.msra.gmra.mxu0 %vm272_vm1, %v2261_v21 }
  0xda   : > { %2265 = vmatmul.msk.f32.vlgmr.msra.gmra.mxu1 %vm272_vm1, %v2261_v21 }
 0x11b   : > { %v440_v31 = vpop.f32.mrf.mxu1 }
 0x11c   : > { %v445_v32 = vadd.f32 %v440_v31, %v354_v30 }
 0x11e   : > { %448 = vst.msk [vmem:[#allocation2 + $0x10] sm:$0xff] %vm256_vm6, %v445_v32 }
 0x125   : > { %v453_v36 = vld [vmem:[#allocation2 + $0x10] sm:$0xff] }
 0x128   : > { %v420_v34 = vpop.f32.mrf.mxu0 }
 0x129   : > { %v444_v52 = vadd.f32 %v420_v34, %v320_v29 }
 0x12c   : > { %v400_v35 = vpop.f32.mrf.mxu3 }
 0x12d   : > { %v443_v49 = vadd.f32 %v400_v35, %v300_v33 }
 0x12e   : > { %v499_v38 = vpop.f32.mrf.mxu2  ;;  %v598_v40 = vpop.f32.mrf.mxu1 }
 0x12f   : > { %v542_v53 = vadd.f32 %v499_v38, %v443_v49 }
 0x130   : > { %v539_v37 = vpop.f32.mrf.mxu0 }
 0x131   : > { %v544_v39 = vadd.f32 %v539_v37, %v453_v36  ;;  %v641_v59 = vadd.f32 %v598_v40, %v542_v53 }
 0x133   : > { %547 = vst.msk [vmem:[#allocation2 + $0x10] sm:$0xff] %vm256_vm6, %v544_v39 }
 0x134   : > { %v519_v42 = vpop.f32.mrf.mxu3 }
 0x135   : > { %v543_v57 = vadd.f32 %v519_v42, %v444_v52 }
 0x136   : > { %v618_v44 = vpop.f32.mrf.mxu2  ;;  %v717_v48 = vpop.f32.mrf.mxu1 }
 0x137   : > { %v642_v60 = vadd.f32 %v618_v44, %v543_v57 }
 0x138   : > { %v697_v45 = vpop.f32.mrf.mxu0 }
 0x139   : > { %v740_v63 = vadd.f32 %v697_v45, %v641_v59  ;;  %v741_v0 = vadd.f32 %v717_v48, %v642_v60 }
 0x13a   : > { %v552_v43 = vld [vmem:[#allocation2 + $0x10] sm:$0xff] }
 0x13c   : > { %v638_v46 = vpop.f32.mrf.mxu3 }
 0x13d   : > { %v643_v47 = vadd.f32 %v638_v46, %v552_v43 }
 0x13e   : > { %v737_v50 = vpop.f32.mrf.mxu2  ;;  %v836_v54 = vpop.f32.mrf.mxu1 }
 0x13f   : > { %646 = vst.msk [vmem:[#allocation2 + $0x10] sm:$0xff] %vm256_vm6, %v643_v47 }
 0x140   : > { %v816_v51 = vpop.f32.mrf.mxu0 }
 0x141   : > { %v840_v6 = vadd.f32 %v816_v51, %v741_v0 }
 0x144   : > { %v796_v56 = vpop.f32.mrf.mxu3 }
 0x145   : > { %v839_v1 = vadd.f32 %v796_v56, %v740_v63 }
 0x146   : > { %v651_v55 = vld [vmem:[#allocation2 + $0x10] sm:$0xff] }
 0x147   : > { %v742_v58 = vadd.f32 %v737_v50, %v651_v55 }
 0x148   : > { %v935_v61 = vpop.f32.mrf.mxu0 }
 0x149   : > { %745 = vst.msk [vmem:[#allocation2 + $0x10] sm:$0xff] %vm256_vm6, %v742_v58 }
 0x14c   : > { %v895_v62 = vpop.f32.mrf.mxu2  ;;  %v915_v4 = vpop.f32.mrf.mxu3 }
 0x14d   : > { %v938_v7 = vadd.f32 %v895_v62, %v839_v1  ;;  %v939_v8 = vadd.f32 %v915_v4, %v840_v6 }
 0x14f   : > { %v994_v2 = vpop.f32.mrf.mxu1 }
 0x150   : > { %v750_v3 = vld [vmem:[#allocation2 + $0x10] sm:$0xff]  ;;  %v1037_v11 = vadd.f32 %v994_v2, %v938_v7 }
 0x151   : > { %v841_v5 = vadd.f32 %v836_v54, %v750_v3 }
 0x153   : > { %844 = vst.msk [vmem:[#allocation2 + $0x10] sm:$0xff] %vm256_vm6, %v841_v5 }
 0x154   : > { %v1014_v9 = vpop.f32.mrf.mxu2  ;;  %v1034_v30 = vpop.f32.mrf.mxu3 }
 0x155   : > { %v1038_v10 = vadd.f32 %v1014_v9, %v939_v8 }
 0x156   : > { %v1093_v12 = vpop.f32.mrf.mxu0 }
 0x157   : > { %v1113_v13 = vpop.f32.mrf.mxu1  ;;  %v1136_v14 = vadd.f32 %v1093_v12, %v1037_v11 }
 0x158   : > { %v1137_v15 = vadd.f32 %v1113_v13, %v1038_v10 }
 0x159   : > { %v1152_v16 = vadd.f32 %v2591_v41, %v1136_v14 }
 0x15a   : > { %v849_v17 = vld [vmem:[#allocation2 + $0x10] sm:$0xff]  ;;  %v1494_v18 = vadd.f32 %v2591_v41, %v1137_v15 }
 0x15b   : > { %v940_v19 = vadd.f32 %v935_v61, %v849_v17  ;;  %v1153_v20 = vmax.f32 %v1152_v16, 0.0 }
 0x15c   : > { %v1496_v21 = vmax.f32 %v1494_v18, 0.0  ;;  %v1133_v35 = vpop.f32.mrf.mxu2 }
 0x15d   : > { %943 = vst.msk [vmem:[#allocation2 + $0x10] sm:$0xff] %vm256_vm6, %v940_v19  ;;  %v2678_v22 = vmin.f32 %v1153_v20, 6.0 }
 0x15e   : > { %v2680_v23 = vmin.f32 %v1496_v21, 6.0 }
 0x15f   : > { %v1156_v24 = vrot.slane %v2678_v22, 1  ;;  %v1157_v25 = vrot.slane %v2678_v22, 2  ;;  %v1158_v26 = vrot.slane %v2678_v22, 3  ;;  %1171 = vst.msk [vmem:[%s2685_s29] sm:$0x1] %vm1170_vm11, %v2678_v22  ;;  %v1159_v27 = vrot.slane %v2678_v22, 4 }
 0x160   : > { %v1714_v28 = vperm.slane %v2680_v23, 0  ;;  %v1160_v29 = vrot.slane %v2678_v22, 5  ;;  %v1161_v31 = vrot.slane %v2678_v22, 6  ;;  %v1162_v33 = vrot.slane %v2678_v22, 7 }
 0x161   : > { %1172 = vst.msk [vmem:[%s2685_s29 + $0x10] sm:$0x1] %vm1170_vm11, %v1156_v24  ;;  %v1191_v38 = vperm.slane %v2678_v22, 0  ;;  %v1604_v39 = vrot.slane %v2680_v23, 2  ;;  %v1501_v42 = vrot.slane %v2680_v23, 7  ;;  %v1607_v44 = vrot.slane %v2680_v23, 5 }
 0x162   : > { %1173 = vst.msk [vmem:[%s2685_s29 + $0x20] sm:$0x1] %vm1170_vm11, %v1157_v25  ;;  %1722 = vrot.lane.b32.xlu1 %v1714_v28, %s2446_s30  ;;  %1670 = vrot.lane.b32.xlu2 %v1714_v28, %s2447_s4  ;;  %v1605_v45 = vrot.slane %v2680_v23, 3  ;;  %v1603_v48 = vrot.slane %v2680_v23, 1  ;;  %v1608_v49 = vrot.slane %v2680_v23, 6  ;;  %v1606_v59 = vrot.slane %v2680_v23, 4 }
 0x163   : > { %1174 = vst.msk [vmem:[%s2685_s29 + $0x30] sm:$0x1] %vm1170_vm11, %v1158_v26  ;;  %1618 = vrot.lane.b32.xlu0 %v1714_v28, %s2448_s5  ;;  %v2736_v40 = vperm.slane %v1604_v39, 0  ;;  %v2745_v43 = vsel %vm1502_vm12, %v2678_v22, %v1501_v42  ;;  %v2749_v46 = vperm.slane %v1607_v44, 0  ;;  %v2762_v51 = vsel %vm1507_vm13, %v2678_v22, %v1501_v42 }
 0x164   : > { %v948_v32 = vld [vmem:[#allocation2 + $0x10] sm:$0xff]  ;;  %1175 = vst.msk [vmem:[%s2685_s29 + $0x40] sm:$0x1] %vm1170_vm11, %v1159_v27  ;;  %v2751_v47 = vperm.slane %v1605_v45, 0  ;;  %v2766_v52 = vsel %vm1510_vm14, %v2678_v22, %v1501_v42  ;;  %v2770_v53 = vsel %vm1504_vm15, %v2678_v22, %v1501_v42  ;;  %v1611_v54 = vperm.slane %v1603_v48, 0 }
 0x165   : > { %v1039_v34 = vadd.f32 %v1034_v30, %v948_v32  ;;  %1176 = vst.msk [vmem:[%s2685_s29 + $0x50] sm:$0x1] %vm1170_vm11, %v1160_v29  ;;  %v2774_v55 = vsel %vm1516_vm0, %v2678_v22, %v1501_v42  ;;  %v2776_v56 = vperm.slane %v1608_v49, 0  ;;  %v2786_v58 = vsel %vm1519_vm2, %v2678_v22, %v1501_v42 }
 0x166   : > { %1177 = vst.msk [vmem:[%s2685_s29 + $0x60] sm:$0x1] %vm1170_vm11, %v1161_v31  ;;  %v2791_v60 = vsel %vm1513_vm3, %v2678_v22, %v1501_v42  ;;  %v2797_v62 = vsel %vm1522_vm4, %v1501_v42, %v2678_v22  ;;  %v1614_v63 = vperm.slane %v1606_v59, 0  ;;  %v1617_v2 = vperm.slane %v1501_v42, 0 }
 0x167   : > { %1042 = vst.msk [vmem:[#allocation2 + $0x10] sm:$0xff] %vm256_vm6, %v1039_v34  ;;  %v1525_v15 = vperm.slane %v2745_v43, 0  ;;  %v1526_v19 = vperm.slane %v2745_v43, 1  ;;  %v2895_v20 = vperm.slane %v1156_v24, 0  ;;  %v2910_v24 = vperm.slane %v1157_v25, 0 }
 0x168   : > { %1178 = vst.msk [vmem:[%s2685_s29 + $0x70] sm:$0x1] %vm1170_vm11, %v1162_v33  ;;  %v2914_v32 = vperm.slane %v1159_v27, 0  ;;  %v2918_v34 = vperm.slane %v1158_v26, 0  ;;  %v2934_v26 = vperm.slane %v1160_v29, 0 }
 0x16a   : > { %1878 = vrot.lane.b32.xlu1 %v1714_v28, %s2449_s6  ;;  %1826 = vrot.lane.b32.xlu2 %v1714_v28, %s2450_s7 }
 0x16b   : > { %1774 = vrot.lane.b32.xlu0 %v1714_v28, %s2451_s9 }
 0x16e   : > { %v1047_v36 = vld [vmem:[#allocation2 + $0x10] sm:$0xff] }
 0x16f   : > { %v1138_v37 = vadd.f32 %v1133_v35, %v1047_v36  ;;  %v2938_v36 = vperm.slane %v1162_v33, 0 }
 0x171   : > { %1141 = vst.msk [vmem:[#allocation2 + $0x10] sm:$0xff] %vm256_vm6, %v1138_v37  ;;  %v2942_v37 = vperm.slane %v1161_v31, 0 }
 0x172   : > { %1199 = vrot.lane.b32.xlu1 %v1191_v38, %s2439_s8  ;;  %1355 = vrot.lane.b32.xlu2 %v1191_v38, %s2452_s10 }
 0x173   : > { %1303 = vrot.lane.b32.xlu0 %v1191_v38, %s2453_s18 }
 0x178   : > { %v1911_v50 = vld [vmem:[#allocation2 + $0x10] sm:$0xff] }
 0x179   : > { %v1913_v57 = vadd.f32 %v1911_v50, %v2591_v41 }
 0x17a   : > { %1251 = vrot.lane.b32.xlu1 %v1191_v38, %s2442_s11  ;;  %1622 = vrot.lane.b32.xlu2 %v2736_v40, %s2448_s5 }
 0x17b   : > { %1459 = vrot.lane.b32.xlu0 %v1191_v38, %s2454_s19  ;;  %v1915_v61 = vmax.f32 %v1913_v57, 0.0 }
 0x17d   : > { %v2793_v41 = vmin.f32 %v1915_v61, 6.0 }
 0x17f   : > { %v2800_v0 = vrot.slane %v2793_v41, 7 }
 0x181   : > { %v2806_v1 = vsel %vm1502_vm12, %v2680_v23, %v2800_v0 }
 0x182   : > { %1407 = vrot.lane.b32.xlu1 %v1191_v38, %s2455_s21  ;;  %1628 = vrot.lane.b32.xlu2 %v2749_v46, %s2448_s5 }
 0x183   : > { %1624 = vrot.lane.b32.xlu0 %v2751_v47, %s2448_s5 }
 0x18a   : > { %1620 = vrot.lane.b32.xlu1 %v1611_v54, %s2448_s5  ;;  %1676 = vrot.lane.b32.xlu2 %v2751_v47, %s2447_s4 }
 0x18b   : > { %1630 = vrot.lane.b32.xlu0 %v2776_v56, %s2448_s5 }
 0x192   : > { %1626 = vrot.lane.b32.xlu1 %v1614_v63, %s2448_s5  ;;  %1682 = vrot.lane.b32.xlu2 %v2776_v56, %s2447_s4 }
 0x193   : > { %1672 = vrot.lane.b32.xlu0 %v1611_v54, %s2447_s4 }
 0x19a   : > { %1632 = vrot.lane.b32.xlu1 %v1617_v2, %s2448_s5  ;;  %1724 = vrot.lane.b32.xlu2 %v1611_v54, %s2446_s30  ;;  %s2076_s5 = sshll.u32 %s2685_s29, 4  ;;  %s2077_s5 = int_to_ptr.vmem [resolvable:$true] %s2076_s5 }
 0x19b   : > { %1678 = vrot.lane.b32.xlu0 %v1614_v63, %s2447_s4 }
 0x1a2   : > { %1674 = vrot.lane.b32.xlu1 %v2736_v40, %s2447_s4  ;;  %1730 = vrot.lane.b32.xlu2 %v1614_v63, %s2446_s30 }
 0x1a3   : > { %1684 = vrot.lane.b32.xlu0 %v1617_v2, %s2447_s4 }
 0x1aa   : > { %1680 = vrot.lane.b32.xlu1 %v2749_v46, %s2447_s4  ;;  %1736 = vrot.lane.b32.xlu2 %v1617_v2, %s2446_s30  ;;  %s2075_s4 = scalar_lea.hbm %s3352_s3, %s2273_s26 }
 0x1ab   : > { %1726 = vrot.lane.b32.xlu0 %v2736_v40, %s2446_s30 }
 0x1b2   : > { %1728 = vrot.lane.b32.xlu1 %v2751_v47, %s2446_s30  ;;  %1778 = vrot.lane.b32.xlu2 %v2736_v40, %s2451_s9 }
 0x1b3   : > { %1732 = vrot.lane.b32.xlu0 %v2749_v46, %s2446_s30 }
 0x1ba   : > { %1734 = vrot.lane.b32.xlu1 %v2776_v56, %s2446_s30  ;;  %1784 = vrot.lane.b32.xlu2 %v2749_v46, %s2451_s9 }
 0x1bb   : > { %1780 = vrot.lane.b32.xlu0 %v2751_v47, %s2451_s9 }
 0x1bc   : > { %v1671_v3 = vpop.permute.xlu2 %1670 }
 0x1bd   : > { %1694 = vst.msk [vmem:[%s2685_s29 + $0x9] sm:$0x1] %vm1170_vm11, %v1671_v3 }
 0x1c2   : > { %1776 = vrot.lane.b32.xlu1 %v1611_v54, %s2451_s9  ;;  %1832 = vrot.lane.b32.xlu2 %v2751_v47, %s2450_s7 }
 0x1c3   : > { %1786 = vrot.lane.b32.xlu0 %v2776_v56, %s2451_s9 }
 0x1c4   : > { %v1827_v4 = vpop.permute.xlu2 %1826 }
 0x1c5   : > { %1850 = vst.msk [vmem:[%s2685_s29 + $0xc] sm:$0x1] %vm1170_vm11, %v1827_v4 }
 0x1ca   : > { %1782 = vrot.lane.b32.xlu1 %v1614_v63, %s2451_s9  ;;  %1838 = vrot.lane.b32.xlu2 %v2776_v56, %s2450_s7 }
 0x1cb   : > { %1828 = vrot.lane.b32.xlu0 %v1611_v54, %s2450_s7 }
 0x1cc   : > { %v1356_v5 = vpop.permute.xlu2 %1355 }
 0x1cd   : > { %1379 = vst.msk [vmem:[%s2685_s29 + $0x4] sm:$0x1] %vm1170_vm11, %v1356_v5 }
 0x1d2   : > { %1788 = vrot.lane.b32.xlu1 %v1617_v2, %s2451_s9  ;;  %1880 = vrot.lane.b32.xlu2 %v1611_v54, %s2449_s6 }
 0x1d3   : > { %1834 = vrot.lane.b32.xlu0 %v1614_v63, %s2450_s7 }
 0x1d4   : > { %v1723_v6 = vpop.permute.xlu1 %1722  ;;  %v1623_v8 = vpop.permute.xlu2 %1622 }
 0x1d5   : > { %1746 = vst.msk [vmem:[%s2685_s29 + $0xa] sm:$0x1] %vm1170_vm11, %v1723_v6  ;;  %v1619_v7 = vpop.permute.xlu0 %1618 }
 0x1d6   : > { %1642 = vst.msk [vmem:[%s2685_s29 + $0x8] sm:$0x1] %vm1170_vm11, %v1619_v7 }
 0x1d7   : > { %1644 = vst.msk [vmem:[%s2685_s29 + $0x28] sm:$0x1] %vm1170_vm11, %v1623_v8 }
 0x1da   : > { %1830 = vrot.lane.b32.xlu1 %v2736_v40, %s2450_s7  ;;  %1886 = vrot.lane.b32.xlu2 %v1614_v63, %s2449_s6 }
 0x1db   : > { %1840 = vrot.lane.b32.xlu0 %v1617_v2, %s2450_s7 }
 0x1dc   : > { %v1879_v9 = vpop.permute.xlu1 %1878  ;;  %v1629_v11 = vpop.permute.xlu2 %1628 }
 0x1dd   : > { %1902 = vst.msk [vmem:[%s2685_s29 + $0xd] sm:$0x1] %vm1170_vm11, %v1879_v9  ;;  %v1775_v10 = vpop.permute.xlu0 %1774 }
 0x1de   : > { %1798 = vst.msk [vmem:[%s2685_s29 + $0xb] sm:$0x1] %vm1170_vm11, %v1775_v10 }
 0x1df   : > { %1647 = vst.msk [vmem:[%s2685_s29 + $0x58] sm:$0x1] %vm1170_vm11, %v1629_v11 }
 0x1e2   : > { %1836 = vrot.lane.b32.xlu1 %v2749_v46, %s2450_s7  ;;  %1892 = vrot.lane.b32.xlu2 %v1617_v2, %s2449_s6  ;;  %s2061_s7 = scalar_lea.sflag [#allocation4], %s226_s27 }
 0x1e3   : > { %1882 = vrot.lane.b32.xlu0 %v2736_v40, %s2449_s6 }
 0x1e4   : > { %v1200_v12 = vpop.permute.xlu1 %1199  ;;  %v1677_v13 = vpop.permute.xlu2 %1676 }
 0x1e5   : > { %v1304_v14 = vpop.permute.xlu0 %1303  ;;  %1223 = vst.msk [vmem:[%s2685_s29 + $0x1] sm:$0x1] %vm1170_vm11, %v1200_v12 }
 0x1e6   : > { %1697 = vst.msk [vmem:[%s2685_s29 + $0x39] sm:$0x1] %vm1170_vm11, %v1677_v13 }
 0x1e7   : > { %1327 = vst.msk [vmem:[%s2685_s29 + $0x3] sm:$0x1] %vm1170_vm11, %v1304_v14 }
 0x1ea   : > { %1884 = vrot.lane.b32.xlu1 %v2751_v47, %s2449_s6  ;;  %1541 = vrot.lane.b32.xlu2 %v1525_v15, %s2456_s23 }
 0x1eb   : > { %1888 = vrot.lane.b32.xlu0 %v2749_v46, %s2449_s6 }
 0x1ec   : > { %v1252_v16 = vpop.permute.xlu1 %1251  ;;  %v1683_v17 = vpop.permute.xlu2 %1682 }
 0x1ed   : > { %v1460_v18 = vpop.permute.xlu0 %1459  ;;  %1275 = vst.msk [vmem:[%s2685_s29 + $0x2] sm:$0x1] %vm1170_vm11, %v1252_v16  ;;  %v1509_v16 = vrot.slane %v2762_v51, 2 }
 0x1ee   : > { %1700 = vst.msk [vmem:[%s2685_s29 + $0x69] sm:$0x1] %vm1170_vm11, %v1683_v17 }
 0x1ef   : > { %1483 = vst.msk [vmem:[%s2685_s29 + $0x6] sm:$0x1] %vm1170_vm11, %v1460_v18  ;;  %v1529_v17 = vperm.slane %v1509_v16, 0 }
 0x1f2   : > { %1890 = vrot.lane.b32.xlu1 %v2776_v56, %s2449_s6  ;;  %1201 = vrot.lane.b32.xlu2 %v2895_v20, %s2439_s8  ;;  %s2078_s6 = sshll.u32 %s2075_s4, 4  ;;  %s2079_s6 = int_to_ptr.hbm [resolvable:$true] %s2078_s6 }
 0x1f3   : > { %1543 = vrot.lane.b32.xlu0 %v1526_v19, %s2456_s23  ;;  %v1506_v19 = vrot.slane %v2770_v53, 1  ;;  %s2370_s9 = sshra.s32 %s2079_s6, 4  ;;  %s2371_s9 = int_to_ptr.hbm [resolvable:$true] %s2370_s9 }
 0x1f4   : > { %v1408_v21 = vpop.permute.xlu1 %1407  ;;  %v1725_v28 = vpop.permute.xlu2 %1724  ;;  %p2377_p1 = scmp.lt.s32.totalorder %s2371_s9, %s3352_s3 }
 0x1f5   : > { %v1625_v30 = vpop.permute.xlu0 %1624  ;;  %1431 = vst.msk [vmem:[%s2685_s29 + $0x5] sm:$0x1] %vm1170_vm11, %v1408_v21  ;;  %v1512_v21 = vrot.slane %v2766_v52, 3 }
 0x1f6   : > { %1747 = vst.msk [vmem:[%s2685_s29 + $0x1a] sm:$0x1] %vm1170_vm11, %v1725_v28 }
 0x1f7   : > { %1645 = vst.msk [vmem:[%s2685_s29 + $0x38] sm:$0x1] %vm1170_vm11, %v1625_v30  ;;  %v1527_v30 = vperm.slane %v1506_v19, 0 }
 0x1fa   : > { %1203 = vrot.lane.b32.xlu1 %v2910_v24, %s2439_s8  ;;  %1205 = vrot.lane.b32.xlu2 %v2918_v34, %s2439_s8 }
 0x1fb   : > { %1207 = vrot.lane.b32.xlu0 %v2914_v32, %s2439_s8 }
 0x1fc   : > { %v1621_v25 = vpop.permute.xlu1 %1620  ;;  %v1731_v35 = vpop.permute.xlu2 %1730 }
 0x1fd   : > { %v1631_v27 = vpop.permute.xlu0 %1630  ;;  %1643 = vst.msk [vmem:[%s2685_s29 + $0x18] sm:$0x1] %vm1170_vm11, %v1621_v25  ;;  %v1518_v25 = vrot.slane %v2774_v55, 5 }
 0x1fe   : > { %1750 = vst.msk [vmem:[%s2685_s29 + $0x4a] sm:$0x1] %vm1170_vm11, %v1731_v35  ;;  %v1530_v35 = vperm.slane %v1509_v16, 1 }
 0x1ff   : > { %1648 = vst.msk [vmem:[%s2685_s29 + $0x68] sm:$0x1] %vm1170_vm11, %v1631_v27  ;;  %v1535_v27 = vperm.slane %v1518_v25, 0 }
 0x202   : > { %1209 = vrot.lane.b32.xlu1 %v2934_v26, %s2439_s8  ;;  %1211 = vrot.lane.b32.xlu2 %v2942_v37, %s2439_s8 }
 0x203   : > { %1213 = vrot.lane.b32.xlu0 %v2938_v36, %s2439_s8  ;;  %s2457_s8 = smov 4  }
 0x204   : > { %v1627_v29 = vpop.permute.xlu1 %1626  ;;  %v1737_v38 = vpop.permute.xlu2 %1736 }
 0x205   : > { %v1673_v33 = vpop.permute.xlu0 %1672  ;;  %1646 = vst.msk [vmem:[%s2685_s29 + $0x48] sm:$0x1] %vm1170_vm11, %v1627_v29 }
 0x206   : > { %1753 = vst.msk [vmem:[%s2685_s29 + $0x7a] sm:$0x1] %vm1170_vm11, %v1737_v38  ;;  %v1521_v38 = vrot.slane %v2786_v58, 6  ;;  %v1536_v58 = vperm.slane %v1518_v25, 1 }
 0x207   : > { %1695 = vst.msk [vmem:[%s2685_s29 + $0x19] sm:$0x1] %vm1170_vm11, %v1673_v33 }
 0x20a   : > { %1257 = vrot.lane.b32.xlu1 %v2918_v34, %s2442_s11  ;;  %1253 = vrot.lane.b32.xlu2 %v2895_v20, %s2442_s11 }
 0x20b   : > { %1255 = vrot.lane.b32.xlu0 %v2910_v24, %s2442_s11 }
 0x20c   : > { %v1633_v22 = vpop.permute.xlu1 %1632  ;;  %v1779_v31 = vpop.permute.xlu2 %1778 }
 0x20d   : > { %v1679_v39 = vpop.permute.xlu0 %1678  ;;  %1649 = vst.msk [vmem:[%s2685_s29 + $0x78] sm:$0x1] %vm1170_vm11, %v1633_v22  ;;  %v1538_v22 = vperm.slane %v1521_v38, 1 }
 0x20e   : > { %1800 = vst.msk [vmem:[%s2685_s29 + $0x2b] sm:$0x1] %vm1170_vm11, %v1779_v31 }
 0x20f   : > { %1698 = vst.msk [vmem:[%s2685_s29 + $0x49] sm:$0x1] %vm1170_vm11, %v1679_v39 }
 0x212   : > { %1263 = vrot.lane.b32.xlu1 %v2942_v37, %s2442_s11  ;;  %1259 = vrot.lane.b32.xlu2 %v2914_v32, %s2442_s11 }
 0x213   : > { %1261 = vrot.lane.b32.xlu0 %v2934_v26, %s2442_s11 }
 0x214   : > { %v1675_v40 = vpop.permute.xlu1 %1674  ;;  %v1785_v42 = vpop.permute.xlu2 %1784 }
 0x215   : > { %v1685_v43 = vpop.permute.xlu0 %1684  ;;  %1696 = vst.msk [vmem:[%s2685_s29 + $0x29] sm:$0x1] %vm1170_vm11, %v1675_v40 }
 0x216   : > { %1803 = vst.msk [vmem:[%s2685_s29 + $0x5b] sm:$0x1] %vm1170_vm11, %v1785_v42  ;;  %v1936_v42 = vperm.slane %v2806_v1, 0 }
 0x217   : > { %1701 = vst.msk [vmem:[%s2685_s29 + $0x79] sm:$0x1] %vm1170_vm11, %v1685_v43  ;;  %v1537_v43 = vperm.slane %v1521_v38, 0 }
 0x21a   : > { %1305 = vrot.lane.b32.xlu1 %v2895_v20, %s2453_s18  ;;  %1265 = vrot.lane.b32.xlu2 %v2938_v36, %s2442_s11  ;;  %s2458_s11 = smov 114  }
 0x21b   : > { %1309 = vrot.lane.b32.xlu0 %v2918_v34, %s2453_s18 }
 0x21c   : > { %v1681_v44 = vpop.permute.xlu1 %1680  ;;  %v1833_v45 = vpop.permute.xlu2 %1832 }
 0x21d   : > { %v1727_v46 = vpop.permute.xlu0 %1726  ;;  %1699 = vst.msk [vmem:[%s2685_s29 + $0x59] sm:$0x1] %vm1170_vm11, %v1681_v44  ;;  %v1922_v44 = vsel %vm1504_vm15, %v2680_v23, %v2800_v0 }
 0x21e   : > { %1853 = vst.msk [vmem:[%s2685_s29 + $0x3c] sm:$0x1] %vm1170_vm11, %v1833_v45 }
 0x21f   : > { %1748 = vst.msk [vmem:[%s2685_s29 + $0x2a] sm:$0x1] %vm1170_vm11, %v1727_v46  ;;  %v1524_v46 = vrot.slane %v2797_v62, 7  ;;  %v1926_v62 = vsel %vm1510_vm14, %v2680_v23, %v2800_v0 }
 0x222   : > { %1311 = vrot.lane.b32.xlu1 %v2914_v32, %s2453_s18  ;;  %1307 = vrot.lane.b32.xlu2 %v2910_v24, %s2453_s18 }
 0x223   : > { %1315 = vrot.lane.b32.xlu0 %v2942_v37, %s2453_s18 }
 0x224   : > { %v1729_v47 = vpop.permute.xlu1 %1728  ;;  %v1839_v48 = vpop.permute.xlu2 %1838 }
 0x225   : > { %v1733_v49 = vpop.permute.xlu0 %1732  ;;  %1749 = vst.msk [vmem:[%s2685_s29 + $0x3a] sm:$0x1] %vm1170_vm11, %v1729_v47 }
 0x226   : > { %1856 = vst.msk [vmem:[%s2685_s29 + $0x6c] sm:$0x1] %vm1170_vm11, %v1839_v48 }
 0x227   : > { %1751 = vst.msk [vmem:[%s2685_s29 + $0x5a] sm:$0x1] %vm1170_vm11, %v1733_v49  ;;  %v1923_v49 = vrot.slane %v1922_v44, 1 }
 0x22a   : > { %1317 = vrot.lane.b32.xlu1 %v2938_v36, %s2453_s18  ;;  %1313 = vrot.lane.b32.xlu2 %v2934_v26, %s2453_s18 }
 0x22b   : > { %1357 = vrot.lane.b32.xlu0 %v2895_v20, %s2452_s10 }
 0x22c   : > { %v1735_v50 = vpop.permute.xlu1 %1734  ;;  %v1881_v54 = vpop.permute.xlu2 %1880 }
 0x22d   : > { %v1781_v56 = vpop.permute.xlu0 %1780  ;;  %1752 = vst.msk [vmem:[%s2685_s29 + $0x6a] sm:$0x1] %vm1170_vm11, %v1735_v50  ;;  %v1539_v50 = vperm.slane %v1524_v46, 0 }
 0x22e   : > { %1903 = vst.msk [vmem:[%s2685_s29 + $0x1d] sm:$0x1] %vm1170_vm11, %v1881_v54  ;;  %v1939_v54 = vperm.slane %v1923_v49, 1 }
 0x22f   : > { %1801 = vst.msk [vmem:[%s2685_s29 + $0x3b] sm:$0x1] %vm1170_vm11, %v1781_v56  ;;  %v1540_v56 = vperm.slane %v1524_v46, 1  ;;  %v2016_v46 = vrot.slane %v2793_v41, 4 }
 0x232   : > { %1359 = vrot.lane.b32.xlu1 %v2910_v24, %s2452_s10  ;;  %1361 = vrot.lane.b32.xlu2 %v2918_v34, %s2452_s10 }
 0x233   : > { %1363 = vrot.lane.b32.xlu0 %v2914_v32, %s2452_s10 }
 0x234   : > { %v1777_v57 = vpop.permute.xlu1 %1776  ;;  %v1887_v59 = vpop.permute.xlu2 %1886 }
 0x235   : > { %v1787_v61 = vpop.permute.xlu0 %1786  ;;  %1799 = vst.msk [vmem:[%s2685_s29 + $0x1b] sm:$0x1] %vm1170_vm11, %v1777_v57 }
 0x236   : > { %1906 = vst.msk [vmem:[%s2685_s29 + $0x4d] sm:$0x1] %vm1170_vm11, %v1887_v59 }
 0x237   : > { %1804 = vst.msk [vmem:[%s2685_s29 + $0x6b] sm:$0x1] %vm1170_vm11, %v1787_v61 }
 0x23a   : > { %1365 = vrot.lane.b32.xlu1 %v2934_v26, %s2452_s10  ;;  %1367 = vrot.lane.b32.xlu2 %v2942_v37, %s2452_s10 }
 0x23b   : > { %1369 = vrot.lane.b32.xlu0 %v2938_v36, %s2452_s10  ;;  %s2372_s10 = scalar_lea.hbm %s2371_s9, 128 }
 0x23c   : > { %v1783_v63 = vpop.permute.xlu1 %1782  ;;  %v1893_v2 = vpop.permute.xlu2 %1892  ;;  %p2373_p12 = scmp.ne.s32.totalorder %s2371_s9, %s2372_s10 }
 0x23d   : > { %v1829_v3 = vpop.permute.xlu0 %1828  ;;  %1802 = vst.msk [vmem:[%s2685_s29 + $0x4b] sm:$0x1] %vm1170_vm11, %v1783_v63  ;;  %v1927_v63 = vrot.slane %v1926_v62, 3 }
 0x23e   : > { %1909 = vst.msk [vmem:[%s2685_s29 + $0x7d] sm:$0x1] %vm1170_vm11, %v1893_v2  ;;  %v1937_v2 = vperm.slane %v2806_v1, 1  ;;  %p2374_p13 = pnand %p2373_p12, %p2521_p4 }
 0x23f   : > { %1851 = vst.msk [vmem:[%s2685_s29 + $0x1c] sm:$0x1] %vm1170_vm11, %v1829_v3  ;;  %v1942_v3 = vperm.slane %v1927_v63, 0 }
 0x240   : > { %p2375_p0 = pneg %p2374_p13 }
 0x242   : > { %1413 = vrot.lane.b32.xlu1 %v2918_v34, %s2455_s21  ;;  %1409 = vrot.lane.b32.xlu2 %v2895_v20, %s2455_s21 }
 0x243   : > { %1411 = vrot.lane.b32.xlu0 %v2910_v24, %s2455_s21 }
 0x244   : > { %v1789_v4 = vpop.permute.xlu1 %1788  ;;  %v1542_v5 = vpop.permute.xlu2 %1541 }
 0x245   : > { %v1835_v6 = vpop.permute.xlu0 %1834  ;;  %1805 = vst.msk [vmem:[%s2685_s29 + $0x7b] sm:$0x1] %vm1170_vm11, %v1789_v4  ;;  %v1938_v4 = vperm.slane %v1923_v49, 0 }
 0x246   : > { %1854 = vst.msk [vmem:[%s2685_s29 + $0x4c] sm:$0x1] %vm1170_vm11, %v1835_v6  ;;  %v1928_v6 = vsel %vm1513_vm3, %v2680_v23, %v2800_v0 }
 0x24a   : > { %1419 = vrot.lane.b32.xlu1 %v2942_v37, %s2455_s21  ;;  %1415 = vrot.lane.b32.xlu2 %v2914_v32, %s2455_s21 }
 0x24b   : > { %1417 = vrot.lane.b32.xlu0 %v2934_v26, %s2455_s21 }
 0x24c   : > { %v1831_v7 = vpop.permute.xlu1 %1830  ;;  %v1202_v9 = vpop.permute.xlu2 %1201 }
 0x24d   : > { %v1841_v8 = vpop.permute.xlu0 %1840  ;;  %1852 = vst.msk [vmem:[%s2685_s29 + $0x2c] sm:$0x1] %vm1170_vm11, %v1831_v7 }
 0x24e   : > { %1857 = vst.msk [vmem:[%s2685_s29 + $0x7c] sm:$0x1] %vm1170_vm11, %v1841_v8 }
 0x24f   : > { %1224 = vst.msk [vmem:[%s2685_s29 + $0x11] sm:$0x1] %vm1170_vm11, %v1202_v9 }
 0x252   : > { %1461 = vrot.lane.b32.xlu1 %v2895_v20, %s2454_s19  ;;  %1421 = vrot.lane.b32.xlu2 %v2938_v36, %s2455_s21 }
 0x253   : > { %1465 = vrot.lane.b32.xlu0 %v2918_v34, %s2454_s19 }
 0x254   : > { %v1837_v10 = vpop.permute.xlu1 %1836  ;;  %v1206_v12 = vpop.permute.xlu2 %1205 }
 0x255   : > { %v1883_v11 = vpop.permute.xlu0 %1882  ;;  %1855 = vst.msk [vmem:[%s2685_s29 + $0x5c] sm:$0x1] %vm1170_vm11, %v1837_v10  ;;  %v1929_v10 = vrot.slane %v1928_v6, 4 }
 0x256   : > { %1904 = vst.msk [vmem:[%s2685_s29 + $0x2d] sm:$0x1] %vm1170_vm11, %v1883_v11 }
 0x257   : > { %1226 = vst.msk [vmem:[%s2685_s29 + $0x31] sm:$0x1] %vm1170_vm11, %v1206_v12  ;;  %v1945_v12 = vperm.slane %v1929_v10, 1 }
 0x25a   : > { %1467 = vrot.lane.b32.xlu1 %v2914_v32, %s2454_s19  ;;  %1463 = vrot.lane.b32.xlu2 %v2910_v24, %s2454_s19  ;;  %v1532_v24 = vperm.slane %v1512_v21, 1  ;;  %v1528_v32 = vperm.slane %v1506_v19, 1  ;;  %v1943_v19 = vperm.slane %v1927_v63, 1 }
 0x25b   : > { %1471 = vrot.lane.b32.xlu0 %v2942_v37, %s2454_s19  ;;  %v1515_v37 = vrot.slane %v2791_v60, 4 }
 0x25c   : > { %v1885_v13 = vpop.permute.xlu1 %1884  ;;  %v1212_v15 = vpop.permute.xlu2 %1211 }
 0x25d   : > { %v1889_v14 = vpop.permute.xlu0 %1888  ;;  %1905 = vst.msk [vmem:[%s2685_s29 + $0x3d] sm:$0x1] %vm1170_vm11, %v1885_v13  ;;  %v1533_v33 = vperm.slane %v1515_v37, 0  ;;  %v1534_v31 = vperm.slane %v1515_v37, 1 }
 0x25e   : > { %1907 = vst.msk [vmem:[%s2685_s29 + $0x5d] sm:$0x1] %vm1170_vm11, %v1889_v14  ;;  %v1932_v14 = vsel %vm1519_vm2, %v2680_v23, %v2800_v0 }
 0x25f   : > { %1229 = vst.msk [vmem:[%s2685_s29 + $0x61] sm:$0x1] %vm1170_vm11, %v1212_v15 }
 0x262   : > { %1473 = vrot.lane.b32.xlu1 %v2938_v36, %s2454_s19  ;;  %1469 = vrot.lane.b32.xlu2 %v2934_v26, %s2454_s19  ;;  %v1531_v26 = vperm.slane %v1512_v21, 0  ;;  %v1930_v21 = vsel %vm1516_vm0, %v2680_v23, %v2800_v0  ;;  %s2376_s19 = scalar_lea.hbm %s3352_s3, 256 }
 0x263   : > { %1549 = vrot.lane.b32.xlu0 %v1529_v17, %s2456_s23  ;;  %p2378_p2 = scmp.lt.s32.totalorder %s2376_s19, %s2372_s10 }
 0x264   : > { %v1891_v18 = vpop.permute.xlu1 %1890  ;;  %v1254_v20 = vpop.permute.xlu2 %1253 }
 0x265   : > { %v1544_v51 = vpop.permute.xlu0 %1543  ;;  %1908 = vst.msk [vmem:[%s2685_s29 + $0x6d] sm:$0x1] %vm1170_vm11, %v1891_v18  ;;  %v1933_v18 = vrot.slane %v1932_v14, 6  ;;  %p2379_p3 = por %p2378_p2, %p2377_p1 }
 0x266   : > { %v1574_v28 = vsel %vm1573_vm5, %v1542_v5, %v1544_v51  ;;  %1276 = vst.msk [vmem:[%s2685_s29 + $0x12] sm:$0x1] %vm1170_vm11, %v1254_v20  ;;  %v1924_v5 = vsel %vm1507_vm13, %v2680_v23, %v2800_v0  ;;  %v1944_v20 = vperm.slane %v1929_v10, 0 }
 0x267   : > { %1590 = vst.msk [vmem:[%s2685_s29 + $0x7] sm:$0x1] %vm1170_vm11, %v1574_v28  ;;  %v1925_v8 = vrot.slane %v1924_v5, 2  ;;  %v1948_v51 = vperm.slane %v1933_v18, 0  ;;  %v1934_v28 = vsel %vm1522_vm4, %v2800_v0, %v2680_v23  ;;  %v1949_v37 = vperm.slane %v1933_v18, 1  ;;  %p2380_p5 = pnand %p2379_p3, %p2375_p0 }
 0x269   : > { %v1940_v11 = vperm.slane %v1925_v8, 0  ;;  %v1941_v13 = vperm.slane %v1925_v8, 1 }
 0x26a   : > { %1545 = vrot.lane.b32.xlu1 %v1527_v30, %s2456_s23  ;;  %1547 = vrot.lane.b32.xlu2 %v1528_v32, %s2456_s23 }
 0x26b   : > { %1555 = vrot.lane.b32.xlu0 %v1532_v24, %s2456_s23  ;;  %v1931_v24 = vrot.slane %v1930_v21, 5 }
 0x26c   : > { %v1204_v53 = vpop.permute.xlu1 %1203  ;;  %v1260_v52 = vpop.permute.xlu2 %1259 }
 0x26d   : > { %v1208_v34 = vpop.permute.xlu0 %1207  ;;  %1225 = vst.msk [vmem:[%s2685_s29 + $0x21] sm:$0x1] %vm1170_vm11, %v1204_v53  ;;  %v1947_v25 = vperm.slane %v1931_v24, 1 }
 0x26e   : > { %1227 = vst.msk [vmem:[%s2685_s29 + $0x41] sm:$0x1] %vm1170_vm11, %v1208_v34  ;;  %v1935_v34 = vrot.slane %v1934_v28, 7 }
 0x26f   : > { %1279 = vst.msk [vmem:[%s2685_s29 + $0x42] sm:$0x1] %vm1170_vm11, %v1260_v52  ;;  %v1946_v52 = vperm.slane %v1931_v24, 0 }
 0x270   : > { %v1951_v23 = vperm.slane %v1935_v34, 1 }
 0x272   : > { %1551 = vrot.lane.b32.xlu1 %v1530_v35, %s2456_s23  ;;  %1553 = vrot.lane.b32.xlu2 %v1531_v26, %s2456_s23 }
 0x273   : > { %1561 = vrot.lane.b32.xlu0 %v1535_v27, %s2456_s23 }
 0x274   : > { %v1210_v36 = vpop.permute.xlu1 %1209  ;;  %v1266_v55 = vpop.permute.xlu2 %1265 }
 0x275   : > { %v1214_v29 = vpop.permute.xlu0 %1213  ;;  %1228 = vst.msk [vmem:[%s2685_s29 + $0x51] sm:$0x1] %vm1170_vm11, %v1210_v36  ;;  %v2014_v36 = vrot.slane %v2793_v41, 2 }
 0x276   : > { %1230 = vst.msk [vmem:[%s2685_s29 + $0x71] sm:$0x1] %vm1170_vm11, %v1214_v29 }
 0x277   : > { %1282 = vst.msk [vmem:[%s2685_s29 + $0x72] sm:$0x1] %vm1170_vm11, %v1266_v55  ;;  %v2022_v29 = vperm.slane %v2014_v36, 0  ;;  %v1950_v55 = vperm.slane %v1935_v34, 0 }
 0x27a   : > { %1557 = vrot.lane.b32.xlu1 %v1533_v33, %s2456_s23  ;;  %1559 = vrot.lane.b32.xlu2 %v1534_v31, %s2456_s23  ;;  %v2017_v31 = vrot.slane %v2793_v41, 5 }
 0x27b   : > { %1567 = vrot.lane.b32.xlu0 %v1538_v22, %s2456_s23 }
 0x27c   : > { %v1258_v60 = vpop.permute.xlu1 %1257  ;;  %v1308_v40 = vpop.permute.xlu2 %1307 }
 0x27d   : > { %v1256_v39 = vpop.permute.xlu0 %1255  ;;  %1278 = vst.msk [vmem:[%s2685_s29 + $0x32] sm:$0x1] %vm1170_vm11, %v1258_v60  ;;  %v2013_v60 = vrot.slane %v2793_v41, 1 }
 0x27e   : > { %1277 = vst.msk [vmem:[%s2685_s29 + $0x22] sm:$0x1] %vm1170_vm11, %v1256_v39  ;;  %v2020_v39 = vperm.slane %v2793_v41, 0 }
 0x27f   : > { %1329 = vst.msk [vmem:[%s2685_s29 + $0x23] sm:$0x1] %vm1170_vm11, %v1308_v40  ;;  %v2025_v40 = vperm.slane %v2017_v31, 0 }
 0x282   : > { %1563 = vrot.lane.b32.xlu1 %v1536_v58, %s2456_s23  ;;  %1565 = vrot.lane.b32.xlu2 %v1537_v43, %s2456_s23  ;;  %v2021_v58 = vperm.slane %v2013_v60, 0  ;;  %v2015_v43 = vrot.slane %v2793_v41, 3 }
 0x283   : > { %1952 = vrot.lane.b32.xlu0 %v1936_v42, %s2457_s8 }
 0x284   : > { %v1264_v45 = vpop.permute.xlu1 %1263  ;;  %v1314_v48 = vpop.permute.xlu2 %1313 }
 0x285   : > { %v1262_v47 = vpop.permute.xlu0 %1261  ;;  %1281 = vst.msk [vmem:[%s2685_s29 + $0x62] sm:$0x1] %vm1170_vm11, %v1264_v45 }
 0x286   : > { %1280 = vst.msk [vmem:[%s2685_s29 + $0x52] sm:$0x1] %vm1170_vm11, %v1262_v47  ;;  %v2023_v47 = vperm.slane %v2015_v43, 0 }
 0x287   : > { %1332 = vst.msk [vmem:[%s2685_s29 + $0x53] sm:$0x1] %vm1170_vm11, %v1314_v48  ;;  %v2024_v48 = vperm.slane %v2016_v46, 0 }
 0x28a   : > { %1569 = vrot.lane.b32.xlu1 %v1539_v50, %s2456_s23  ;;  %1571 = vrot.lane.b32.xlu2 %v1540_v56, %s2456_s23  ;;  %v2018_v50 = vrot.slane %v2793_v41, 6 }
 0x28b   : > { %1958 = vrot.lane.b32.xlu0 %v1939_v54, %s2457_s8 }
 0x28c   : > { %v1306_v57 = vpop.permute.xlu1 %1305  ;;  %v1362_v61 = vpop.permute.xlu2 %1361  ;;  %v2026_v62 = vperm.slane %v2018_v50, 0 }
 0x28d   : > { %v1310_v59 = vpop.permute.xlu0 %1309  ;;  %1328 = vst.msk [vmem:[%s2685_s29 + $0x13] sm:$0x1] %vm1170_vm11, %v1306_v57  ;;  %v2027_v57 = vperm.slane %v2800_v0, 0 }
 0x28e   : > { %1330 = vst.msk [vmem:[%s2685_s29 + $0x33] sm:$0x1] %vm1170_vm11, %v1310_v59 }
 0x28f   : > { %1382 = vst.msk [vmem:[%s2685_s29 + $0x34] sm:$0x1] %vm1170_vm11, %v1362_v61 }
 0x292   : > { %1954 = vrot.lane.b32.xlu1 %v1937_v2, %s2457_s8  ;;  %1956 = vrot.lane.b32.xlu2 %v1938_v4, %s2457_s8 }
 0x293   : > { %1964 = vrot.lane.b32.xlu0 %v1942_v3, %s2457_s8 }
 0x294   : > { %v1312_v7 = vpop.permute.xlu1 %1311  ;;  %v1368_v9 = vpop.permute.xlu2 %1367 }
 0x295   : > { %v1316_v1 = vpop.permute.xlu0 %1315  ;;  %1331 = vst.msk [vmem:[%s2685_s29 + $0x43] sm:$0x1] %vm1170_vm11, %v1312_v7 }
 0x296   : > { %1333 = vst.msk [vmem:[%s2685_s29 + $0x63] sm:$0x1] %vm1170_vm11, %v1316_v1 }
 0x297   : > { %1385 = vst.msk [vmem:[%s2685_s29 + $0x64] sm:$0x1] %vm1170_vm11, %v1368_v9 }
 0x29a   : > { %1960 = vrot.lane.b32.xlu1 %v1940_v11, %s2457_s8  ;;  %1962 = vrot.lane.b32.xlu2 %v1941_v13, %s2457_s8 }
 0x29b   : > { %1970 = vrot.lane.b32.xlu0 %v1945_v12, %s2457_s8 }
 0x29c   : > { %v1318_v15 = vpop.permute.xlu1 %1317  ;;  %v1410_v17 = vpop.permute.xlu2 %1409 }
 0x29d   : > { %v1358_v16 = vpop.permute.xlu0 %1357  ;;  %1334 = vst.msk [vmem:[%s2685_s29 + $0x73] sm:$0x1] %vm1170_vm11, %v1318_v15 }
 0x29e   : > { %1380 = vst.msk [vmem:[%s2685_s29 + $0x14] sm:$0x1] %vm1170_vm11, %v1358_v16 }
 0x29f   : > { %1432 = vst.msk [vmem:[%s2685_s29 + $0x15] sm:$0x1] %vm1170_vm11, %v1410_v17 }
 0x2a2   : > { %1966 = vrot.lane.b32.xlu1 %v1943_v19, %s2457_s8  ;;  %1968 = vrot.lane.b32.xlu2 %v1944_v20, %s2457_s8 }
 0x2a3   : > { %1976 = vrot.lane.b32.xlu0 %v1948_v51, %s2457_s8 }
 0x2a4   : > { %v1360_v30 = vpop.permute.xlu1 %1359  ;;  %v1416_v53 = vpop.permute.xlu2 %1415 }
 0x2a5   : > { %v1364_v32 = vpop.permute.xlu0 %1363  ;;  %1381 = vst.msk [vmem:[%s2685_s29 + $0x24] sm:$0x1] %vm1170_vm11, %v1360_v30 }
 0x2a6   : > { %1383 = vst.msk [vmem:[%s2685_s29 + $0x44] sm:$0x1] %vm1170_vm11, %v1364_v32 }
 0x2a7   : > { %1435 = vst.msk [vmem:[%s2685_s29 + $0x45] sm:$0x1] %vm1170_vm11, %v1416_v53 }
 0x2aa   : > { %1972 = vrot.lane.b32.xlu1 %v1946_v52, %s2457_s8  ;;  %1974 = vrot.lane.b32.xlu2 %v1947_v25, %s2457_s8 }
 0x2ab   : > { %1982 = vrot.lane.b32.xlu0 %v1951_v23, %s2457_s8 }
 0x2ac   : > { %v1366_v35 = vpop.permute.xlu1 %1365  ;;  %v1422_v26 = vpop.permute.xlu2 %1421 }
 0x2ad   : > { %v1370_v27 = vpop.permute.xlu0 %1369  ;;  %1384 = vst.msk [vmem:[%s2685_s29 + $0x54] sm:$0x1] %vm1170_vm11, %v1366_v35 }
 0x2ae   : > { %1386 = vst.msk [vmem:[%s2685_s29 + $0x74] sm:$0x1] %vm1170_vm11, %v1370_v27 }
 0x2af   : > { %1438 = vst.msk [vmem:[%s2685_s29 + $0x75] sm:$0x1] %vm1170_vm11, %v1422_v26 }
 0x2b2   : > { %1978 = vrot.lane.b32.xlu1 %v1949_v37, %s2457_s8  ;;  %1980 = vrot.lane.b32.xlu2 %v1950_v55, %s2457_s8 }
 0x2b3   : > { %2032 = vrot.lane.b32.xlu0 %v2022_v29, %s2458_s11 }
 0x2b4   : > { %v1414_v38 = vpop.permute.xlu1 %1413  ;;  %v1464_v22 = vpop.permute.xlu2 %1463 }
 0x2b5   : > { %v1412_v33 = vpop.permute.xlu0 %1411  ;;  %1434 = vst.msk [vmem:[%s2685_s29 + $0x35] sm:$0x1] %vm1170_vm11, %v1414_v38 }
 0x2b6   : > { %1433 = vst.msk [vmem:[%s2685_s29 + $0x25] sm:$0x1] %vm1170_vm11, %v1412_v33 }
 0x2b7   : > { %1485 = vst.msk [vmem:[%s2685_s29 + $0x26] sm:$0x1] %vm1170_vm11, %v1464_v22 }
 0x2ba   : > { %2028 = vrot.lane.b32.xlu1 %v2020_v39, %s2458_s11  ;;  %2030 = vrot.lane.b32.xlu2 %v2021_v58, %s2458_s11 }
 0x2bb   : > { %2038 = vrot.lane.b32.xlu0 %v2025_v40, %s2458_s11 }
 0x2bc   : > { %v1420_v42 = vpop.permute.xlu1 %1419  ;;  %v1470_v45 = vpop.permute.xlu2 %1469 }
 0x2bd   : > { %v1418_v44 = vpop.permute.xlu0 %1417  ;;  %1437 = vst.msk [vmem:[%s2685_s29 + $0x65] sm:$0x1] %vm1170_vm11, %v1420_v42 }
 0x2be   : > { %1436 = vst.msk [vmem:[%s2685_s29 + $0x55] sm:$0x1] %vm1170_vm11, %v1418_v44 }
 0x2bf   : > { %1488 = vst.msk [vmem:[%s2685_s29 + $0x56] sm:$0x1] %vm1170_vm11, %v1470_v45 }
 0x2c2   : > { %2034 = vrot.lane.b32.xlu1 %v2023_v47, %s2458_s11  ;;  %2036 = vrot.lane.b32.xlu2 %v2024_v48, %s2458_s11 }
 0x2c4   : > { %v1462_v49 = vpop.permute.xlu1 %1461  ;;  %v1548_v56 = vpop.permute.xlu2 %1547 }
 0x2c5   : > { %v1466_v54 = vpop.permute.xlu0 %1465  ;;  %1484 = vst.msk [vmem:[%s2685_s29 + $0x16] sm:$0x1] %vm1170_vm11, %v1462_v49 }
 0x2c6   : > { %1486 = vst.msk [vmem:[%s2685_s29 + $0x36] sm:$0x1] %vm1170_vm11, %v1466_v54 }
 0x2ca   : > { %2040 = vrot.lane.b32.xlu1 %v2026_v62, %s2458_s11  ;;  %2042 = vrot.lane.b32.xlu2 %v2027_v57, %s2458_s11 }
 0x2cc   : > { %v1468_v59 = vpop.permute.xlu1 %1467  ;;  %v1554_v41 = vpop.permute.xlu2 %1553 }
 0x2cd   : > { %v1472_v61 = vpop.permute.xlu0 %1471  ;;  %1487 = vst.msk [vmem:[%s2685_s29 + $0x46] sm:$0x1] %vm1170_vm11, %v1468_v59 }
 0x2ce   : > { %1489 = vst.msk [vmem:[%s2685_s29 + $0x66] sm:$0x1] %vm1170_vm11, %v1472_v61 }
 0x2d4   : > { %v1474_v63 = vpop.permute.xlu1 %1473  ;;  %v1560_v3 = vpop.permute.xlu2 %1559 }
 0x2d5   : > { %v1550_v2 = vpop.permute.xlu0 %1549  ;;  %1490 = vst.msk [vmem:[%s2685_s29 + $0x76] sm:$0x1] %vm1170_vm11, %v1474_v63 }
 0x2dc   : > { %v1546_v0 = vpop.permute.xlu1 %1545  ;;  %v1566_v6 = vpop.permute.xlu2 %1565 }
 0x2dd   : > { %v1556_v4 = vpop.permute.xlu0 %1555  ;;  %v1575_v5 = vsel %vm1573_vm5, %v1546_v0, %v1548_v56 }
 0x2de   : > { %v1577_v7 = vsel %vm1573_vm5, %v1554_v41, %v1556_v4  ;;  %1591 = vst.msk [vmem:[%s2685_s29 + $0x17] sm:$0x1] %vm1170_vm11, %v1575_v5 }
 0x2df   : > { %1593 = vst.msk [vmem:[%s2685_s29 + $0x37] sm:$0x1] %vm1170_vm11, %v1577_v7 }
 0x2e4   : > { %v1552_v8 = vpop.permute.xlu1 %1551  ;;  %v1572_v10 = vpop.permute.xlu2 %1571 }
 0x2e5   : > { %v1562_v1 = vpop.permute.xlu0 %1561  ;;  %v1576_v9 = vsel %vm1573_vm5, %v1550_v2, %v1552_v8 }
 0x2e6   : > { %1592 = vst.msk [vmem:[%s2685_s29 + $0x27] sm:$0x1] %vm1170_vm11, %v1576_v9 }
 0x2ec   : > { %v1558_v11 = vpop.permute.xlu1 %1557  ;;  %v1957_v14 = vpop.permute.xlu2 %1956 }
 0x2ed   : > { %v1568_v12 = vpop.permute.xlu0 %1567  ;;  %v1578_v13 = vsel %vm1573_vm5, %v1558_v11, %v1560_v3 }
 0x2ee   : > { %v1580_v15 = vsel %vm1573_vm5, %v1566_v6, %v1568_v12  ;;  %1594 = vst.msk [vmem:[%s2685_s29 + $0x47] sm:$0x1] %vm1170_vm11, %v1578_v13 }
 0x2ef   : > { %1596 = vst.msk [vmem:[%s2685_s29 + $0x67] sm:$0x1] %vm1170_vm11, %v1580_v15 }
 0x2f4   : > { %v1564_v16 = vpop.permute.xlu1 %1563  ;;  %v1963_v19 = vpop.permute.xlu2 %1962 }
 0x2f5   : > { %v1953_v17 = vpop.permute.xlu0 %1952  ;;  %v1579_v18 = vsel %vm1573_vm5, %v1562_v1, %v1564_v16 }
 0x2f6   : > { %1595 = vst.msk [vmem:[%s2685_s29 + $0x57] sm:$0x1] %vm1170_vm11, %v1579_v18 }
 0x2fc   : > { %v1570_v51 = vpop.permute.xlu1 %1569  ;;  %v1969_v28 = vpop.permute.xlu2 %1968 }
 0x2fd   : > { %v1959_v20 = vpop.permute.xlu0 %1958  ;;  %v1581_v21 = vsel %vm1573_vm5, %v1570_v51, %v1572_v10 }
 0x2fe   : > { %v1985_v30 = vsel %vm272_vm1, %v1957_v14, %v1959_v20  ;;  %1597 = vst.msk [vmem:[%s2685_s29 + $0x77] sm:$0x1] %vm1170_vm11, %v1581_v21 }
 0x2ff   : > { %2001 = vst.msk [vmem:[%s2685_s29 + $0x1e] sm:$0x1] %vm1170_vm11, %v1985_v30 }
 0x304   : > { %v1955_v24 = vpop.permute.xlu1 %1954  ;;  %v1975_v34 = vpop.permute.xlu2 %1974 }
 0x305   : > { %v1965_v32 = vpop.permute.xlu0 %1964  ;;  %v1984_v53 = vsel %vm272_vm1, %v1953_v17, %v1955_v24 }
 0x306   : > { %2000 = vst.msk [vmem:[%s2685_s29 + $0xe] sm:$0x1] %vm1170_vm11, %v1984_v53 }
 0x30c   : > { %v1961_v52 = vpop.permute.xlu1 %1960  ;;  %v1981_v35 = vpop.permute.xlu2 %1980 }
 0x30d   : > { %v1971_v23 = vpop.permute.xlu0 %1970  ;;  %v1986_v25 = vsel %vm272_vm1, %v1961_v52, %v1963_v19 }
 0x30e   : > { %v1988_v27 = vsel %vm272_vm1, %v1969_v28, %v1971_v23  ;;  %2002 = vst.msk [vmem:[%s2685_s29 + $0x2e] sm:$0x1] %vm1170_vm11, %v1986_v25 }
 0x30f   : > { %2004 = vst.msk [vmem:[%s2685_s29 + $0x4e] sm:$0x1] %vm1170_vm11, %v1988_v27 }
 0x314   : > { %v1967_v26 = vpop.permute.xlu1 %1966  ;;  %v2031_v29 = vpop.permute.xlu2 %2030 }
 0x315   : > { %v1977_v36 = vpop.permute.xlu0 %1976  ;;  %v1987_v37 = vsel %vm272_vm1, %v1965_v32, %v1967_v26  ;;  %2053 = vst.msk [vmem:[%s2685_s29 + $0x1f] sm:$0x1] %vm1170_vm11, %v2031_v29 }
 0x316   : > { %2003 = vst.msk [vmem:[%s2685_s29 + $0x3e] sm:$0x1] %vm1170_vm11, %v1987_v37 }
 0x31c   : > { %v1973_v55 = vpop.permute.xlu1 %1972  ;;  %v2037_v22 = vpop.permute.xlu2 %2036 }
 0x31d   : > { %v1983_v38 = vpop.permute.xlu0 %1982  ;;  %v1989_v33 = vsel %vm272_vm1, %v1973_v55, %v1975_v34  ;;  %2056 = vst.msk [vmem:[%s2685_s29 + $0x4f] sm:$0x1] %vm1170_vm11, %v2037_v22 }
 0x31e   : > { %v1991_v31 = vsel %vm272_vm1, %v1981_v35, %v1983_v38  ;;  %2005 = vst.msk [vmem:[%s2685_s29 + $0x5e] sm:$0x1] %vm1170_vm11, %v1989_v33 }
 0x31f   : > { %2007 = vst.msk [vmem:[%s2685_s29 + $0x7e] sm:$0x1] %vm1170_vm11, %v1991_v31 }
 0x324   : > { %v1979_v60 = vpop.permute.xlu1 %1978  ;;  %v2043_v58 = vpop.permute.xlu2 %2042 }
 0x325   : > { %v2033_v39 = vpop.permute.xlu0 %2032  ;;  %v1990_v40 = vsel %vm272_vm1, %v1977_v36, %v1979_v60  ;;  %2059 = vst.msk [vmem:[%s2685_s29 + $0x7f] sm:$0x1] %vm1170_vm11, %v2043_v58 }
 0x326   : > { %2054 = vst.msk [vmem:[%s2685_s29 + $0x2f] sm:$0x1] %vm1170_vm11, %v2033_v39 }
 0x327   : > { %2006 = vst.msk [vmem:[%s2685_s29 + $0x6e] sm:$0x1] %vm1170_vm11, %v1990_v40 }
 0x32c   : > { %v2029_v42 = vpop.permute.xlu1 %2028 }
 0x32d   : > { %v2039_v43 = vpop.permute.xlu0 %2038  ;;  %2052 = vst.msk [vmem:[%s2685_s29 + $0xf] sm:$0x1] %vm1170_vm11, %v2029_v42 }
 0x32e   : > { %2057 = vst.msk [vmem:[%s2685_s29 + $0x5f] sm:$0x1] %vm1170_vm11, %v2039_v43 }
 0x334   : > { %v2035_v44 = vpop.permute.xlu1 %2034 }
 0x335   : > { %2055 = vst.msk [vmem:[%s2685_s29 + $0x3f] sm:$0x1] %vm1170_vm11, %v2035_v44 }
 0x33c   : > { %v2041_v45 = vpop.permute.xlu1 %2040 }
 0x33d   : > { %2058 = vst.msk [vmem:[%s2685_s29 + $0x6f] sm:$0x1] %vm1170_vm11, %v2041_v45 }
 0x33e   : > { %2383 = shalt.err (!%p2380_p5)
}
 0x33f   : > { %s2459_s27 = smov 128   ;;  %s2460_s29 = smov 8  }
 0x340   : > { %2275 = dma.vmem_to_hbm [thread:$0]  (%p2521_p4), %s2077_s5, 2048, %s2079_s6, %s2061_s7, %s2459_s27, %s2459_s27, %s2460_s29  }
 0x341 PF: > { %p2281_p6 = scmp.ge.s32.totalorder %s2434_s17, 2  ;;  %s2093_s8 = sand.u32 1, %s2414_s12  }
 0x342   : > { %s2094_s11 = scalar_lea.sflag [#allocation4], %s2093_s8 }
 0x343   : > { %p2278_p7 = pnand %p2281_p6, %p2528_p8 }
 0x345   : > { %p2279_p9 = pneg %p2278_p7 }
 0x347   : > { %2409 = dma.done.wait (%p2279_p9), %s2094_s11, 2048  }
 0x348   : > { %2411 = vsyncadd (%p2279_p9), %s2094_s11, 4294965248  ;;  %s16_s17 = sadd.s32 1, %s2434_s17   ;;  %s3355_s12 = smov %s2418_s13 }
 0x349   : > { %p13_p10 = scmp.ge.s32.totalorder %s16_s17, 4   ;;  %s3356_s13 = smov %s2422_s14 }
 0x34a   : > { %s3357_s14 = smov %s2534_s25  ;;  %s3358_s15 = smov %s2430_s16 }
 0x34b   : > { %s3359_s16 = smov %s3361_s20  ;;  %15 = sbr.rel (!%p13_p10) target bundleno = 4 (0x4), region = 98 }
 0x350   :  { %2100 = vsyncpa [#allocation4], 1 }
 0x351   :  { %2102 = vsyncpa [#allocation4 + $0x1], 1 }

</bundles_post_ra>
